<compile_context>
chip_gen: v6e
topology: v6e:2x2x1
jax: 0.10.0
libtpu: 0.0.40
codegen_flags: <defaults>
</compile_context>

<pallas_src>
import jax
import jax.numpy as jnp
from jax import lax
from jax.experimental import pallas as pl
from jax.experimental.pallas import tpu as pltpu


def _implicit_kernel(a_ref, b_ref, c_ref, d_ref, x0_ref, u_ref, out_ref):
    # a_ref:  (n, n)  bf16, already strictly upper triangular
    # b_ref:  (n, p)  bf16
    # c_ref:  (q, n)  bf16
    # d_ref:  (q, p)  bf16
    # x0_ref: (n, bm) f32
    # u_ref:  (bm, p) f32   (batch-major slice of U_in; never transposed in HBM)
    # out_ref:(q, bm) f32   (m is the lane dim -> dense stores)
    n = a_ref.shape[0]

    A = a_ref[...]                                   # bf16 weights stay resident
    U_bf = u_ref[...].astype(jnp.bfloat16)           # (bm, p)

    # Z = B @ U^T  -> (n, bm); contract the p dims, no materialized transpose.
    Z = lax.dot_general(
        b_ref[...], U_bf,
        dimension_numbers=(((1,), (1,)), ((), ())),
        preferred_element_type=jnp.float32,
    )

    # Fixed point X = relu(A X + Z); exact after n steps for strictly-triu A.
    # Fully unrolled so the short serial chain is visible to the scheduler.
    def body(_, X):
        AX = jnp.dot(A, X.astype(jnp.bfloat16),
                     preferred_element_type=jnp.float32)
        return jnp.maximum(AX + Z, 0.0)

    X = lax.fori_loop(0, n, body, x0_ref[...], unroll=True)

    # Readout: C @ X + D @ U^T  -> (q, bm)
    out_ref[...] = (
        jnp.dot(c_ref[...], X.astype(jnp.bfloat16),
                preferred_element_type=jnp.float32)
        + lax.dot_general(
            d_ref[...], U_bf,
            dimension_numbers=(((1,), (1,)), ((), ())),
            preferred_element_type=jnp.float32,
        )
    )


@jax.jit
def implicit_model_forward(U_in, A, B, C, D, X0):
    """U_in: (m, p) batch-major. Returns (m, q)."""
    n = A.shape[0]
    q, p = D.shape
    m = U_in.shape[0]

    # Hoist the ImplicitFunctionTriu projection and the bf16 weight casts out of
    # the kernel (weights are per-call constants; mask is pure prologue VPU work).
    A_tri = jnp.triu(A, k=1).astype(jnp.bfloat16)
    B_bf = B.astype(jnp.bfloat16)
    C_bf = C.astype(jnp.bfloat16)
    D_bf = D.astype(jnp.bfloat16)

    # Batch tile: lane-dense (multiple of 128) for real batches, full extent for
    # small ones.  At bm=512 the per-step VMEM footprint is a few hundred KB --
    # comfortably inside v7x's 64 MiB physical / 32 MiB scoped VMEM.
    bm = m if m <= 512 else 512
    grid = (pl.cdiv(m, bm),)

    def weight_spec(shape):
        return pl.BlockSpec(shape, lambda i: (0, 0))

    out_qm = pl.pallas_call(
        _implicit_kernel,
        out_shape=jax.ShapeDtypeStruct((q, m), jnp.float32),
        grid=grid,
        in_specs=[
            weight_spec((n, n)),                       # A (triu, bf16)
            weight_spec((n, p)),                       # B
            weight_spec((q, n)),                       # C
            weight_spec((q, p)),                       # D
            pl.BlockSpec((n, bm), lambda i: (0, i)),   # X0, batch along lanes
            pl.BlockSpec((bm, p), lambda i: (i, 0)),   # U_in, batch-major (no transpose)
        ],
        out_specs=pl.BlockSpec((q, bm), lambda i: (0, i)),  # lane-dense on m
        compiler_params=pltpu.CompilerParams(
            dimension_semantics=("parallel",),         # shard batch across TCs (v7x)
        ),
    )(A_tri, B_bf, C_bf, D_bf, X0, U_in)

    # Tiny (q, m) -> (m, q) glue transpose to match the module's return layout.
    return out_qm.T


def _reference_forward(U_in, A, B, C, D, X0):
    """Pure-JAX f32 reference mirroring the PyTorch semantics."""
    U = U_in.T
    A_tri = jnp.triu(A, k=1)
    Z = B @ U
    X = X0
    for _ in range(A.shape[0]):
        X = jnp.maximum(A_tri @ X + Z, 0.0)
    return (C @ X + D @ U).T


if __name__ == "__main__":
    # n = hidden state, m = batch, p = input features, q = output features
    n, m, p, q = 32, 8, 16, 8

    key = jax.random.PRNGKey(0)
    kA, kB, kC, kD, kX0, kU = jax.random.split(key, 6)

    # Deterministic init matching torch.randn(...)/n scaling in __init__
    A = jax.random.normal(kA, (n, n), jnp.float32) / n
    B = jax.random.normal(kB, (n, p), jnp.float32) / n
    C = jax.random.normal(kC, (q, n), jnp.float32) / n
    D = jax.random.normal(kD, (q, p), jnp.float32) / n
    X0 = jax.random.normal(kX0, (n, m), jnp.float32)

    U_in = jax.random.normal(kU, (m, p), jnp.float32)  # (batch, p)

    out = implicit_model_forward(U_in, A, B, C, D, X0)
    out = jax.block_until_ready(out)

    ref = _reference_forward(U_in, A, B, C, D, X0)
    assert out.shape == (m, q), out.shape
    # bf16 MXU inputs with f32 accumulation -> relaxed tolerance vs. f32 reference.
    assert jnp.allclose(out, ref, atol=2e-2, rtol=2e-2), "mismatch vs reference"

    print("KERNEL_OK")
</pallas_src>

<mosaic_0001>
module attributes {stable_mosaic.version = 11 : i64} {
  func.func @_implicit_kernel(%arg0: i32, %arg1: memref<32x32xbf16, #tpu.memory_space<vmem>>, %arg2: memref<32x16xbf16, #tpu.memory_space<vmem>>, %arg3: memref<8x32xbf16, #tpu.memory_space<vmem>>, %arg4: memref<8x16xbf16, #tpu.memory_space<vmem>>, %arg5: memref<32x8xf32, #tpu.memory_space<vmem>>, %arg6: memref<8x16xf32, #tpu.memory_space<vmem>>, %arg7: memref<8x8xf32, #tpu.memory_space<vmem>>) attributes {dimension_semantics = [#tpu.dimension_semantics<parallel>], iteration_bounds = array<i64: 1>, scalar_prefetch = 0 : i64, scratch_operands = 0 : i64, tpu.core_type = #tpu.core_type<tc>, window_params = [{pipeline_mode = #tpu.pipeline_mode<synchronous>, transform_indices = @transform_0, window_bounds = array<i64: 32, 32>}, {pipeline_mode = #tpu.pipeline_mode<synchronous>, transform_indices = @transform_1, window_bounds = array<i64: 32, 16>}, {pipeline_mode = #tpu.pipeline_mode<synchronous>, transform_indices = @transform_2, window_bounds = array<i64: 8, 32>}, {pipeline_mode = #tpu.pipeline_mode<synchronous>, transform_indices = @transform_3, window_bounds = array<i64: 8, 16>}, {transform_indices = @transform_4, window_bounds = array<i64: 32, 8>}, {transform_indices = @transform_5, window_bounds = array<i64: 8, 16>}, {transform_indices = @transform_6, window_bounds = array<i64: 8, 8>}]} {
    %c0 = arith.constant 0 : index
    %c0_0 = arith.constant 0 : index
    %0 = vector.load %arg1[%c0, %c0_0] : memref<32x32xbf16, #tpu.memory_space<vmem>>, vector<32x32xbf16>
    %c0_1 = arith.constant 0 : index
    %c0_2 = arith.constant 0 : index
    %1 = vector.load %arg6[%c0_1, %c0_2] : memref<8x16xf32, #tpu.memory_space<vmem>>, vector<8x16xf32>
    %2 = arith.truncf %1 : vector<8x16xf32> to vector<8x16xbf16>
    %c0_3 = arith.constant 0 : index
    %c0_4 = arith.constant 0 : index
    %3 = vector.load %arg2[%c0_3, %c0_4] : memref<32x16xbf16, #tpu.memory_space<vmem>>, vector<32x16xbf16>
    %cst = arith.constant dense<0.000000e+00> : vector<32x8xf32>
    %4 = tpu.matmul %3, %2, %cst {dimension_numbers = #tpu.dot_dimension_numbers<[1], [1], [0], [0], [0, 0, 1, 0], [], []>} : vector<32x16xbf16>, vector<8x16xbf16>, vector<32x8xf32> -> vector<32x8xf32>
    %c0_5 = arith.constant 0 : index
    %c0_6 = arith.constant 0 : index
    %5 = vector.load %arg5[%c0_5, %c0_6] : memref<32x8xf32, #tpu.memory_space<vmem>>, vector<32x8xf32>
    %c0_i32 = arith.constant 0 : i32
    %6 = arith.truncf %5 : vector<32x8xf32> to vector<32x8xbf16>
    %cst_7 = arith.constant dense<0.000000e+00> : vector<32x8xf32>
    %7 = tpu.matmul %0, %6, %cst_7 {dimension_numbers = #tpu.dot_dimension_numbers<[1], [0], [0], [1], [0, 0, 1, 1], [], []>} : vector<32x32xbf16>, vector<32x8xbf16>, vector<32x8xf32> -> vector<32x8xf32>
    %8 = arith.addf %7, %4 : vector<32x8xf32>
    %cst_8 = arith.constant 0.000000e+00 : f32
    %9 = vector.broadcast %cst_8 : f32 to vector<32x8xf32>
    %10 = arith.maximumf %8, %9 : vector<32x8xf32>
    %c1_i32 = arith.constant 1 : i32
    %11 = arith.truncf %10 : vector<32x8xf32> to vector<32x8xbf16>
    %cst_9 = arith.constant dense<0.000000e+00> : vector<32x8xf32>
    %12 = tpu.matmul %0, %11, %cst_9 {dimension_numbers = #tpu.dot_dimension_numbers<[1], [0], [0], [1], [0, 0, 1, 1], [], []>} : vector<32x32xbf16>, vector<32x8xbf16>, vector<32x8xf32> -> vector<32x8xf32>
    %13 = arith.addf %12, %4 : vector<32x8xf32>
    %cst_10 = arith.constant 0.000000e+00 : f32
    %14 = vector.broadcast %cst_10 : f32 to vector<32x8xf32>
    %15 = arith.maximumf %13, %14 : vector<32x8xf32>
    %c2_i32 = arith.constant 2 : i32
    %16 = arith.truncf %15 : vector<32x8xf32> to vector<32x8xbf16>
    %cst_11 = arith.constant dense<0.000000e+00> : vector<32x8xf32>
    %17 = tpu.matmul %0, %16, %cst_11 {dimension_numbers = #tpu.dot_dimension_numbers<[1], [0], [0], [1], [0, 0, 1, 1], [], []>} : vector<32x32xbf16>, vector<32x8xbf16>, vector<32x8xf32> -> vector<32x8xf32>
    %18 = arith.addf %17, %4 : vector<32x8xf32>
    %cst_12 = arith.constant 0.000000e+00 : f32
    %19 = vector.broadcast %cst_12 : f32 to vector<32x8xf32>
    %20 = arith.maximumf %18, %19 : vector<32x8xf32>
    %c3_i32 = arith.constant 3 : i32
    %21 = arith.truncf %20 : vector<32x8xf32> to vector<32x8xbf16>
    %cst_13 = arith.constant dense<0.000000e+00> : vector<32x8xf32>
    %22 = tpu.matmul %0, %21, %cst_13 {dimension_numbers = #tpu.dot_dimension_numbers<[1], [0], [0], [1], [0, 0, 1, 1], [], []>} : vector<32x32xbf16>, vector<32x8xbf16>, vector<32x8xf32> -> vector<32x8xf32>
    %23 = arith.addf %22, %4 : vector<32x8xf32>
    %cst_14 = arith.constant 0.000000e+00 : f32
    %24 = vector.broadcast %cst_14 : f32 to vector<32x8xf32>
    %25 = arith.maximumf %23, %24 : vector<32x8xf32>
    %c4_i32 = arith.constant 4 : i32
    %26 = arith.truncf %25 : vector<32x8xf32> to vector<32x8xbf16>
    %cst_15 = arith.constant dense<0.000000e+00> : vector<32x8xf32>
    %27 = tpu.matmul %0, %26, %cst_15 {dimension_numbers = #tpu.dot_dimension_numbers<[1], [0], [0], [1], [0, 0, 1, 1], [], []>} : vector<32x32xbf16>, vector<32x8xbf16>, vector<32x8xf32> -> vector<32x8xf32>
    %28 = arith.addf %27, %4 : vector<32x8xf32>
    %cst_16 = arith.constant 0.000000e+00 : f32
    %29 = vector.broadcast %cst_16 : f32 to vector<32x8xf32>
    %30 = arith.maximumf %28, %29 : vector<32x8xf32>
    %c5_i32 = arith.constant 5 : i32
    %31 = arith.truncf %30 : vector<32x8xf32> to vector<32x8xbf16>
    %cst_17 = arith.constant dense<0.000000e+00> : vector<32x8xf32>
    %32 = tpu.matmul %0, %31, %cst_17 {dimension_numbers = #tpu.dot_dimension_numbers<[1], [0], [0], [1], [0, 0, 1, 1], [], []>} : vector<32x32xbf16>, vector<32x8xbf16>, vector<32x8xf32> -> vector<32x8xf32>
    %33 = arith.addf %32, %4 : vector<32x8xf32>
    %cst_18 = arith.constant 0.000000e+00 : f32
    %34 = vector.broadcast %cst_18 : f32 to vector<32x8xf32>
    %35 = arith.maximumf %33, %34 : vector<32x8xf32>
    %c6_i32 = arith.constant 6 : i32
    %36 = arith.truncf %35 : vector<32x8xf32> to vector<32x8xbf16>
    %cst_19 = arith.constant dense<0.000000e+00> : vector<32x8xf32>
    %37 = tpu.matmul %0, %36, %cst_19 {dimension_numbers = #tpu.dot_dimension_numbers<[1], [0], [0], [1], [0, 0, 1, 1], [], []>} : vector<32x32xbf16>, vector<32x8xbf16>, vector<32x8xf32> -> vector<32x8xf32>
    %38 = arith.addf %37, %4 : vector<32x8xf32>
    %cst_20 = arith.constant 0.000000e+00 : f32
    %39 = vector.broadcast %cst_20 : f32 to vector<32x8xf32>
    %40 = arith.maximumf %38, %39 : vector<32x8xf32>
    %c7_i32 = arith.constant 7 : i32
    %41 = arith.truncf %40 : vector<32x8xf32> to vector<32x8xbf16>
    %cst_21 = arith.constant dense<0.000000e+00> : vector<32x8xf32>
    %42 = tpu.matmul %0, %41, %cst_21 {dimension_numbers = #tpu.dot_dimension_numbers<[1], [0], [0], [1], [0, 0, 1, 1], [], []>} : vector<32x32xbf16>, vector<32x8xbf16>, vector<32x8xf32> -> vector<32x8xf32>
    %43 = arith.addf %42, %4 : vector<32x8xf32>
    %cst_22 = arith.constant 0.000000e+00 : f32
    %44 = vector.broadcast %cst_22 : f32 to vector<32x8xf32>
    %45 = arith.maximumf %43, %44 : vector<32x8xf32>
    %c8_i32 = arith.constant 8 : i32
    %46 = arith.truncf %45 : vector<32x8xf32> to vector<32x8xbf16>
    %cst_23 = arith.constant dense<0.000000e+00> : vector<32x8xf32>
    %47 = tpu.matmul %0, %46, %cst_23 {dimension_numbers = #tpu.dot_dimension_numbers<[1], [0], [0], [1], [0, 0, 1, 1], [], []>} : vector<32x32xbf16>, vector<32x8xbf16>, vector<32x8xf32> -> vector<32x8xf32>
    %48 = arith.addf %47, %4 : vector<32x8xf32>
    %cst_24 = arith.constant 0.000000e+00 : f32
    %49 = vector.broadcast %cst_24 : f32 to vector<32x8xf32>
    %50 = arith.maximumf %48, %49 : vector<32x8xf32>
    %c9_i32 = arith.constant 9 : i32
    %51 = arith.truncf %50 : vector<32x8xf32> to vector<32x8xbf16>
    %cst_25 = arith.constant dense<0.000000e+00> : vector<32x8xf32>
    %52 = tpu.matmul %0, %51, %cst_25 {dimension_numbers = #tpu.dot_dimension_numbers<[1], [0], [0], [1], [0, 0, 1, 1], [], []>} : vector<32x32xbf16>, vector<32x8xbf16>, vector<32x8xf32> -> vector<32x8xf32>
    %53 = arith.addf %52, %4 : vector<32x8xf32>
    %cst_26 = arith.constant 0.000000e+00 : f32
    %54 = vector.broadcast %cst_26 : f32 to vector<32x8xf32>
    %55 = arith.maximumf %53, %54 : vector<32x8xf32>
    %c10_i32 = arith.constant 10 : i32
    %56 = arith.truncf %55 : vector<32x8xf32> to vector<32x8xbf16>
    %cst_27 = arith.constant dense<0.000000e+00> : vector<32x8xf32>
    %57 = tpu.matmul %0, %56, %cst_27 {dimension_numbers = #tpu.dot_dimension_numbers<[1], [0], [0], [1], [0, 0, 1, 1], [], []>} : vector<32x32xbf16>, vector<32x8xbf16>, vector<32x8xf32> -> vector<32x8xf32>
    %58 = arith.addf %57, %4 : vector<32x8xf32>
    %cst_28 = arith.constant 0.000000e+00 : f32
    %59 = vector.broadcast %cst_28 : f32 to vector<32x8xf32>
    %60 = arith.maximumf %58, %59 : vector<32x8xf32>
    %c11_i32 = arith.constant 11 : i32
    %61 = arith.truncf %60 : vector<32x8xf32> to vector<32x8xbf16>
    %cst_29 = arith.constant dense<0.000000e+00> : vector<32x8xf32>
    %62 = tpu.matmul %0, %61, %cst_29 {dimension_numbers = #tpu.dot_dimension_numbers<[1], [0], [0], [1], [0, 0, 1, 1], [], []>} : vector<32x32xbf16>, vector<32x8xbf16>, vector<32x8xf32> -> vector<32x8xf32>
    %63 = arith.addf %62, %4 : vector<32x8xf32>
    %cst_30 = arith.constant 0.000000e+00 : f32
    %64 = vector.broadcast %cst_30 : f32 to vector<32x8xf32>
    %65 = arith.maximumf %63, %64 : vector<32x8xf32>
    %c12_i32 = arith.constant 12 : i32
    %66 = arith.truncf %65 : vector<32x8xf32> to vector<32x8xbf16>
    %cst_31 = arith.constant dense<0.000000e+00> : vector<32x8xf32>
    %67 = tpu.matmul %0, %66, %cst_31 {dimension_numbers = #tpu.dot_dimension_numbers<[1], [0], [0], [1], [0, 0, 1, 1], [], []>} : vector<32x32xbf16>, vector<32x8xbf16>, vector<32x8xf32> -> vector<32x8xf32>
    %68 = arith.addf %67, %4 : vector<32x8xf32>
    %cst_32 = arith.constant 0.000000e+00 : f32
    %69 = vector.broadcast %cst_32 : f32 to vector<32x8xf32>
    %70 = arith.maximumf %68, %69 : vector<32x8xf32>
    %c13_i32 = arith.constant 13 : i32
    %71 = arith.truncf %70 : vector<32x8xf32> to vector<32x8xbf16>
    %cst_33 = arith.constant dense<0.000000e+00> : vector<32x8xf32>
    %72 = tpu.matmul %0, %71, %cst_33 {dimension_numbers = #tpu.dot_dimension_numbers<[1], [0], [0], [1], [0, 0, 1, 1], [], []>} : vector<32x32xbf16>, vector<32x8xbf16>, vector<32x8xf32> -> vector<32x8xf32>
    %73 = arith.addf %72, %4 : vector<32x8xf32>
    %cst_34 = arith.constant 0.000000e+00 : f32
    %74 = vector.broadcast %cst_34 : f32 to vector<32x8xf32>
    %75 = arith.maximumf %73, %74 : vector<32x8xf32>
    %c14_i32 = arith.constant 14 : i32
    %76 = arith.truncf %75 : vector<32x8xf32> to vector<32x8xbf16>
    %cst_35 = arith.constant dense<0.000000e+00> : vector<32x8xf32>
    %77 = tpu.matmul %0, %76, %cst_35 {dimension_numbers = #tpu.dot_dimension_numbers<[1], [0], [0], [1], [0, 0, 1, 1], [], []>} : vector<32x32xbf16>, vector<32x8xbf16>, vector<32x8xf32> -> vector<32x8xf32>
    %78 = arith.addf %77, %4 : vector<32x8xf32>
    %cst_36 = arith.constant 0.000000e+00 : f32
    %79 = vector.broadcast %cst_36 : f32 to vector<32x8xf32>
    %80 = arith.maximumf %78, %79 : vector<32x8xf32>
    %c15_i32 = arith.constant 15 : i32
    %81 = arith.truncf %80 : vector<32x8xf32> to vector<32x8xbf16>
    %cst_37 = arith.constant dense<0.000000e+00> : vector<32x8xf32>
    %82 = tpu.matmul %0, %81, %cst_37 {dimension_numbers = #tpu.dot_dimension_numbers<[1], [0], [0], [1], [0, 0, 1, 1], [], []>} : vector<32x32xbf16>, vector<32x8xbf16>, vector<32x8xf32> -> vector<32x8xf32>
    %83 = arith.addf %82, %4 : vector<32x8xf32>
    %cst_38 = arith.constant 0.000000e+00 : f32
    %84 = vector.broadcast %cst_38 : f32 to vector<32x8xf32>
    %85 = arith.maximumf %83, %84 : vector<32x8xf32>
    %c16_i32 = arith.constant 16 : i32
    %86 = arith.truncf %85 : vector<32x8xf32> to vector<32x8xbf16>
    %cst_39 = arith.constant dense<0.000000e+00> : vector<32x8xf32>
    %87 = tpu.matmul %0, %86, %cst_39 {dimension_numbers = #tpu.dot_dimension_numbers<[1], [0], [0], [1], [0, 0, 1, 1], [], []>} : vector<32x32xbf16>, vector<32x8xbf16>, vector<32x8xf32> -> vector<32x8xf32>
    %88 = arith.addf %87, %4 : vector<32x8xf32>
    %cst_40 = arith.constant 0.000000e+00 : f32
    %89 = vector.broadcast %cst_40 : f32 to vector<32x8xf32>
    %90 = arith.maximumf %88, %89 : vector<32x8xf32>
    %c17_i32 = arith.constant 17 : i32
    %91 = arith.truncf %90 : vector<32x8xf32> to vector<32x8xbf16>
    %cst_41 = arith.constant dense<0.000000e+00> : vector<32x8xf32>
    %92 = tpu.matmul %0, %91, %cst_41 {dimension_numbers = #tpu.dot_dimension_numbers<[1], [0], [0], [1], [0, 0, 1, 1], [], []>} : vector<32x32xbf16>, vector<32x8xbf16>, vector<32x8xf32> -> vector<32x8xf32>
    %93 = arith.addf %92, %4 : vector<32x8xf32>
    %cst_42 = arith.constant 0.000000e+00 : f32
    %94 = vector.broadcast %cst_42 : f32 to vector<32x8xf32>
    %95 = arith.maximumf %93, %94 : vector<32x8xf32>
    %c18_i32 = arith.constant 18 : i32
    %96 = arith.truncf %95 : vector<32x8xf32> to vector<32x8xbf16>
    %cst_43 = arith.constant dense<0.000000e+00> : vector<32x8xf32>
    %97 = tpu.matmul %0, %96, %cst_43 {dimension_numbers = #tpu.dot_dimension_numbers<[1], [0], [0], [1], [0, 0, 1, 1], [], []>} : vector<32x32xbf16>, vector<32x8xbf16>, vector<32x8xf32> -> vector<32x8xf32>
    %98 = arith.addf %97, %4 : vector<32x8xf32>
    %cst_44 = arith.constant 0.000000e+00 : f32
    %99 = vector.broadcast %cst_44 : f32 to vector<32x8xf32>
    %100 = arith.maximumf %98, %99 : vector<32x8xf32>
    %c19_i32 = arith.constant 19 : i32
    %101 = arith.truncf %100 : vector<32x8xf32> to vector<32x8xbf16>
    %cst_45 = arith.constant dense<0.000000e+00> : vector<32x8xf32>
    %102 = tpu.matmul %0, %101, %cst_45 {dimension_numbers = #tpu.dot_dimension_numbers<[1], [0], [0], [1], [0, 0, 1, 1], [], []>} : vector<32x32xbf16>, vector<32x8xbf16>, vector<32x8xf32> -> vector<32x8xf32>
    %103 = arith.addf %102, %4 : vector<32x8xf32>
    %cst_46 = arith.constant 0.000000e+00 : f32
    %104 = vector.broadcast %cst_46 : f32 to vector<32x8xf32>
    %105 = arith.maximumf %103, %104 : vector<32x8xf32>
    %c20_i32 = arith.constant 20 : i32
    %106 = arith.truncf %105 : vector<32x8xf32> to vector<32x8xbf16>
    %cst_47 = arith.constant dense<0.000000e+00> : vector<32x8xf32>
    %107 = tpu.matmul %0, %106, %cst_47 {dimension_numbers = #tpu.dot_dimension_numbers<[1], [0], [0], [1], [0, 0, 1, 1], [], []>} : vector<32x32xbf16>, vector<32x8xbf16>, vector<32x8xf32> -> vector<32x8xf32>
    %108 = arith.addf %107, %4 : vector<32x8xf32>
    %cst_48 = arith.constant 0.000000e+00 : f32
    %109 = vector.broadcast %cst_48 : f32 to vector<32x8xf32>
    %110 = arith.maximumf %108, %109 : vector<32x8xf32>
    %c21_i32 = arith.constant 21 : i32
    %111 = arith.truncf %110 : vector<32x8xf32> to vector<32x8xbf16>
    %cst_49 = arith.constant dense<0.000000e+00> : vector<32x8xf32>
    %112 = tpu.matmul %0, %111, %cst_49 {dimension_numbers = #tpu.dot_dimension_numbers<[1], [0], [0], [1], [0, 0, 1, 1], [], []>} : vector<32x32xbf16>, vector<32x8xbf16>, vector<32x8xf32> -> vector<32x8xf32>
    %113 = arith.addf %112, %4 : vector<32x8xf32>
    %cst_50 = arith.constant 0.000000e+00 : f32
    %114 = vector.broadcast %cst_50 : f32 to vector<32x8xf32>
    %115 = arith.maximumf %113, %114 : vector<32x8xf32>
    %c22_i32 = arith.constant 22 : i32
    %116 = arith.truncf %115 : vector<32x8xf32> to vector<32x8xbf16>
    %cst_51 = arith.constant dense<0.000000e+00> : vector<32x8xf32>
    %117 = tpu.matmul %0, %116, %cst_51 {dimension_numbers = #tpu.dot_dimension_numbers<[1], [0], [0], [1], [0, 0, 1, 1], [], []>} : vector<32x32xbf16>, vector<32x8xbf16>, vector<32x8xf32> -> vector<32x8xf32>
    %118 = arith.addf %117, %4 : vector<32x8xf32>
    %cst_52 = arith.constant 0.000000e+00 : f32
    %119 = vector.broadcast %cst_52 : f32 to vector<32x8xf32>
    %120 = arith.maximumf %118, %119 : vector<32x8xf32>
    %c23_i32 = arith.constant 23 : i32
    %121 = arith.truncf %120 : vector<32x8xf32> to vector<32x8xbf16>
    %cst_53 = arith.constant dense<0.000000e+00> : vector<32x8xf32>
    %122 = tpu.matmul %0, %121, %cst_53 {dimension_numbers = #tpu.dot_dimension_numbers<[1], [0], [0], [1], [0, 0, 1, 1], [], []>} : vector<32x32xbf16>, vector<32x8xbf16>, vector<32x8xf32> -> vector<32x8xf32>
    %123 = arith.addf %122, %4 : vector<32x8xf32>
    %cst_54 = arith.constant 0.000000e+00 : f32
    %124 = vector.broadcast %cst_54 : f32 to vector<32x8xf32>
    %125 = arith.maximumf %123, %124 : vector<32x8xf32>
    %c24_i32 = arith.constant 24 : i32
    %126 = arith.truncf %125 : vector<32x8xf32> to vector<32x8xbf16>
    %cst_55 = arith.constant dense<0.000000e+00> : vector<32x8xf32>
    %127 = tpu.matmul %0, %126, %cst_55 {dimension_numbers = #tpu.dot_dimension_numbers<[1], [0], [0], [1], [0, 0, 1, 1], [], []>} : vector<32x32xbf16>, vector<32x8xbf16>, vector<32x8xf32> -> vector<32x8xf32>
    %128 = arith.addf %127, %4 : vector<32x8xf32>
    %cst_56 = arith.constant 0.000000e+00 : f32
    %129 = vector.broadcast %cst_56 : f32 to vector<32x8xf32>
    %130 = arith.maximumf %128, %129 : vector<32x8xf32>
    %c25_i32 = arith.constant 25 : i32
    %131 = arith.truncf %130 : vector<32x8xf32> to vector<32x8xbf16>
    %cst_57 = arith.constant dense<0.000000e+00> : vector<32x8xf32>
    %132 = tpu.matmul %0, %131, %cst_57 {dimension_numbers = #tpu.dot_dimension_numbers<[1], [0], [0], [1], [0, 0, 1, 1], [], []>} : vector<32x32xbf16>, vector<32x8xbf16>, vector<32x8xf32> -> vector<32x8xf32>
    %133 = arith.addf %132, %4 : vector<32x8xf32>
    %cst_58 = arith.constant 0.000000e+00 : f32
    %134 = vector.broadcast %cst_58 : f32 to vector<32x8xf32>
    %135 = arith.maximumf %133, %134 : vector<32x8xf32>
    %c26_i32 = arith.constant 26 : i32
    %136 = arith.truncf %135 : vector<32x8xf32> to vector<32x8xbf16>
    %cst_59 = arith.constant dense<0.000000e+00> : vector<32x8xf32>
    %137 = tpu.matmul %0, %136, %cst_59 {dimension_numbers = #tpu.dot_dimension_numbers<[1], [0], [0], [1], [0, 0, 1, 1], [], []>} : vector<32x32xbf16>, vector<32x8xbf16>, vector<32x8xf32> -> vector<32x8xf32>
    %138 = arith.addf %137, %4 : vector<32x8xf32>
    %cst_60 = arith.constant 0.000000e+00 : f32
    %139 = vector.broadcast %cst_60 : f32 to vector<32x8xf32>
    %140 = arith.maximumf %138, %139 : vector<32x8xf32>
    %c27_i32 = arith.constant 27 : i32
    %141 = arith.truncf %140 : vector<32x8xf32> to vector<32x8xbf16>
    %cst_61 = arith.constant dense<0.000000e+00> : vector<32x8xf32>
    %142 = tpu.matmul %0, %141, %cst_61 {dimension_numbers = #tpu.dot_dimension_numbers<[1], [0], [0], [1], [0, 0, 1, 1], [], []>} : vector<32x32xbf16>, vector<32x8xbf16>, vector<32x8xf32> -> vector<32x8xf32>
    %143 = arith.addf %142, %4 : vector<32x8xf32>
    %cst_62 = arith.constant 0.000000e+00 : f32
    %144 = vector.broadcast %cst_62 : f32 to vector<32x8xf32>
    %145 = arith.maximumf %143, %144 : vector<32x8xf32>
    %c28_i32 = arith.constant 28 : i32
    %146 = arith.truncf %145 : vector<32x8xf32> to vector<32x8xbf16>
    %cst_63 = arith.constant dense<0.000000e+00> : vector<32x8xf32>
    %147 = tpu.matmul %0, %146, %cst_63 {dimension_numbers = #tpu.dot_dimension_numbers<[1], [0], [0], [1], [0, 0, 1, 1], [], []>} : vector<32x32xbf16>, vector<32x8xbf16>, vector<32x8xf32> -> vector<32x8xf32>
    %148 = arith.addf %147, %4 : vector<32x8xf32>
    %cst_64 = arith.constant 0.000000e+00 : f32
    %149 = vector.broadcast %cst_64 : f32 to vector<32x8xf32>
    %150 = arith.maximumf %148, %149 : vector<32x8xf32>
    %c29_i32 = arith.constant 29 : i32
    %151 = arith.truncf %150 : vector<32x8xf32> to vector<32x8xbf16>
    %cst_65 = arith.constant dense<0.000000e+00> : vector<32x8xf32>
    %152 = tpu.matmul %0, %151, %cst_65 {dimension_numbers = #tpu.dot_dimension_numbers<[1], [0], [0], [1], [0, 0, 1, 1], [], []>} : vector<32x32xbf16>, vector<32x8xbf16>, vector<32x8xf32> -> vector<32x8xf32>
    %153 = arith.addf %152, %4 : vector<32x8xf32>
    %cst_66 = arith.constant 0.000000e+00 : f32
    %154 = vector.broadcast %cst_66 : f32 to vector<32x8xf32>
    %155 = arith.maximumf %153, %154 : vector<32x8xf32>
    %c30_i32 = arith.constant 30 : i32
    %156 = arith.truncf %155 : vector<32x8xf32> to vector<32x8xbf16>
    %cst_67 = arith.constant dense<0.000000e+00> : vector<32x8xf32>
    %157 = tpu.matmul %0, %156, %cst_67 {dimension_numbers = #tpu.dot_dimension_numbers<[1], [0], [0], [1], [0, 0, 1, 1], [], []>} : vector<32x32xbf16>, vector<32x8xbf16>, vector<32x8xf32> -> vector<32x8xf32>
    %158 = arith.addf %157, %4 : vector<32x8xf32>
    %cst_68 = arith.constant 0.000000e+00 : f32
    %159 = vector.broadcast %cst_68 : f32 to vector<32x8xf32>
    %160 = arith.maximumf %158, %159 : vector<32x8xf32>
    %c31_i32 = arith.constant 31 : i32
    %161 = arith.truncf %160 : vector<32x8xf32> to vector<32x8xbf16>
    %cst_69 = arith.constant dense<0.000000e+00> : vector<32x8xf32>
    %162 = tpu.matmul %0, %161, %cst_69 {dimension_numbers = #tpu.dot_dimension_numbers<[1], [0], [0], [1], [0, 0, 1, 1], [], []>} : vector<32x32xbf16>, vector<32x8xbf16>, vector<32x8xf32> -> vector<32x8xf32>
    %163 = arith.addf %162, %4 : vector<32x8xf32>
    %cst_70 = arith.constant 0.000000e+00 : f32
    %164 = vector.broadcast %cst_70 : f32 to vector<32x8xf32>
    %165 = arith.maximumf %163, %164 : vector<32x8xf32>
    %c0_71 = arith.constant 0 : index
    %c0_72 = arith.constant 0 : index
    %166 = vector.load %arg3[%c0_71, %c0_72] : memref<8x32xbf16, #tpu.memory_space<vmem>>, vector<8x32xbf16>
    %167 = arith.truncf %165 : vector<32x8xf32> to vector<32x8xbf16>
    %cst_73 = arith.constant dense<0.000000e+00> : vector<8x8xf32>
    %168 = tpu.matmul %166, %167, %cst_73 {dimension_numbers = #tpu.dot_dimension_numbers<[1], [0], [0], [1], [0, 0, 1, 1], [], []>} : vector<8x32xbf16>, vector<32x8xbf16>, vector<8x8xf32> -> vector<8x8xf32>
    %c0_74 = arith.constant 0 : index
    %c0_75 = arith.constant 0 : index
    %169 = vector.load %arg4[%c0_74, %c0_75] : memref<8x16xbf16, #tpu.memory_space<vmem>>, vector<8x16xbf16>
    %cst_76 = arith.constant dense<0.000000e+00> : vector<8x8xf32>
    %170 = tpu.matmul %169, %2, %cst_76 {dimension_numbers = #tpu.dot_dimension_numbers<[1], [1], [0], [0], [0, 0, 1, 0], [], []>} : vector<8x16xbf16>, vector<8x16xbf16>, vector<8x8xf32> -> vector<8x8xf32>
    %171 = arith.addf %168, %170 : vector<8x8xf32>
    %c0_77 = arith.constant 0 : index
    %c0_78 = arith.constant 0 : index
    %172 = vector.load %arg7[%c0_77, %c0_78] : memref<8x8xf32, #tpu.memory_space<vmem>>, vector<8x8xf32>
    tpu.vector_store %arg7[%c0_77, %c0_78], %171 {strides = array<i32>} : memref<8x8xf32, #tpu.memory_space<vmem>>, vector<8x8xf32>,
    return
  }
  func.func @transform_0(%arg0: i32) -> (i32, i32) {
    %c0_i32 = arith.constant 0 : i32
    %c0_i32_0 = arith.constant 0 : i32
    %c0_i32_1 = arith.constant 0 : i32
    return %c0_i32, %c0_i32_0 : i32, i32
  }
  func.func @transform_1(%arg0: i32) -> (i32, i32) {
    %c0_i32 = arith.constant 0 : i32
    %c0_i32_0 = arith.constant 0 : i32
    %c0_i32_1 = arith.constant 0 : i32
    return %c0_i32, %c0_i32_0 : i32, i32
  }
  func.func @transform_2(%arg0: i32) -> (i32, i32) {
    %c0_i32 = arith.constant 0 : i32
    %c0_i32_0 = arith.constant 0 : i32
    %c0_i32_1 = arith.constant 0 : i32
    return %c0_i32, %c0_i32_0 : i32, i32
  }
  func.func @transform_3(%arg0: i32) -> (i32, i32) {
    %c0_i32 = arith.constant 0 : i32
    %c0_i32_0 = arith.constant 0 : i32
    %c0_i32_1 = arith.constant 0 : i32
    return %c0_i32, %c0_i32_0 : i32, i32
  }
  func.func @transform_4(%arg0: i32) -> (i32, i32) {
    %c0_i32 = arith.constant 0 : i32
    %c0_i32_0 = arith.constant 0 : i32
    return %c0_i32, %arg0 : i32, i32
  }
  func.func @transform_5(%arg0: i32) -> (i32, i32) {
    %c0_i32 = arith.constant 0 : i32
    %c0_i32_0 = arith.constant 0 : i32
    return %arg0, %c0_i32 : i32, i32
  }
  func.func @transform_6(%arg0: i32) -> (i32, i32) {
    %c0_i32 = arith.constant 0 : i32
    %c0_i32_0 = arith.constant 0 : i32
    return %c0_i32, %arg0 : i32, i32
  }
}

</mosaic_0001>

<bundles_post_ra>
// kernel: implicit_model_forward.1
= control target key start
LH: loop header
LB: loop body
LE: loop exit
PB: predicated region body
PF: predicated region fallthrough
CT: control target
= control target key end

     0   :  { %vm44_vm0 = vcmask 130048   ;;  %vm119_vm1 = vcmask 261120   ;;  %vm2474_vm2 = vmmov 0   ;;  %vm1974_vm3 = vcmask 64512   ;;  %s2834_s5 = inlined_call_operand.vmem [shape: f32[8,16], index: 5, kind: input, shape index: {}]   ;;  %s2835_s4 = inlined_call_operand.vmem [shape: f32[32,8], index: 4, kind: input, shape index: {}]   ;;  %s2836_s1 = inlined_call_operand.vmem [shape: bf16[32,16], index: 1, kind: input, shape index: {}]   ;;  %s2837_s0 = inlined_call_operand.vmem [shape: bf16[32,32], index: 0, kind: input, shape index: {}]   ;;  %s2838_s3 = inlined_call_operand.vmem [shape: bf16[8,16], index: 3, kind: input, shape index: {}]   ;;  %s2839_s2 = inlined_call_operand.vmem [shape: bf16[8,32], index: 2, kind: input, shape index: {}]   ;;  %s2840_s6 = inlined_call_operand.vmem [shape: f32[8,8], index: 6, kind: output, shape index: {}]  }
   0x1   :  { %v28_v0 = vld [vmem:[%s2834_s5] sm:$0xff]  ;;  %v105_v1 = vld [vmem:[%s2835_s4 + $0x10] sm:$0xff]  ;;  %v106_v2 = vld [vmem:[%s2835_s4 + $0x18] sm:$0xff] }
   0x2   :  { %v29_v3 = vpack.c.bf16 %v28_v0, %v28_v0  ;;  %v108_v4 = vpack.c.bf16 %v106_v2, %v105_v1  ;;  %v103_v5 = vld [vmem:[%s2835_s4] sm:$0xff]  ;;  %v104_v6 = vld [vmem:[%s2835_s4 + $0x8] sm:$0xff] }
   0x3   :  { %v107_v7 = vpack.c.bf16 %v104_v6, %v103_v5  ;;  %v2467_v8 = vld [vmem:[%s2836_s1] sm:$0xff]   ;;  %v2469_v11 = vld [vmem:[%s2836_s1 + $0x8] sm:$0xff]  }
   0x4   :  { %2464 = vmatprep.subr.msk.bf16.mxu0 %vm44_vm0, %v29_v3  ;;  %2194 = vmatprep.subr.bf16.mxu1 %v108_v4  ;;  %v2530_v9 = vsel %vm44_vm0, %v29_v3, 0  ;;  %v2535_v10 = vld [vmem:[%s2837_s0] sm:$0xff]   ;;  %v2547_v12 = vld [vmem:[%s2837_s0 + $0x8] sm:$0xff]  }
   0x5   :  { %2189 = vmatpush3.bf16.xpose.msra.mxu0 %v2530_v9  ;;  %2195 = vmatpush3.bf16.msra.mxu1 %v108_v4 }
   0x6   :  { %2196 = vmatprep.subr.bf16.mxu1 %v107_v7  ;;  %2190 = vmatprep.mubr.msk.bf16.mxu0 %vm44_vm0, %v2467_v8 }
   0x7   :  { %2198 = vmatprep.mubr.msk.bf16.mxu1 %vm119_vm1, %v2535_v10 }
   0x9   :  { %2197 = vmatpush3.bf16.msra.mxu1 %v107_v7 }
   0xc   :  { %2191 = vmatmul.mubr.msk.bf16.vlgmr.msra.gmra.mxu0 %vm44_vm0, %v2469_v11  ;;  %2199 = vmatmul.mubr.msk.bf16.vlgmr.msra.gmra.mxu1 %vm119_vm1, %v2547_v12 }
   0xd   :  { %2206 = vmatprep.mubr.msk.bf16.mxu0 %vm119_vm1, %v2535_v10  ;;  %2214 = vmatprep.mubr.msk.bf16.mxu1 %vm119_vm1, %v2535_v10 }
  0xcc   :  { %v2556_v13 = vpop.f32.mrf.mxu0  ;;  %v2200_v14 = vpop.f32.mrf.mxu1 }
  0xcd   :  { %v169_v17 = vadd.f32 %v2200_v14, %v2556_v13 }
  0xce   :  { %v2558_v15 = vpop.f32.mrf.mxu0  ;;  %v160_v16 = vpop.f32.mrf.mxu1 }
  0xcf   :  { %v161_v20 = vadd.f32 %v160_v16, %v2558_v15  ;;  %v177_v24 = vmax.f32 %v169_v17, 0.0 }
  0xd0   :  { %v2561_v18 = vpop.f32.mrf.mxu0  ;;  %v2201_v19 = vpop.f32.mrf.mxu1 }
  0xd1   :  { %v172_v21 = vadd.f32 %v2201_v19, %v2561_v18  ;;  %v175_v27 = vmax.f32 %v161_v20, 0.0 }
  0xd2   :  { %v2565_v22 = vpop.f32.mrf.mxu0  ;;  %v163_v23 = vpop.f32.mrf.mxu1 }
  0xd3   :  { %v178_v25 = vmax.f32 %v172_v21, 0.0  ;;  %v164_v26 = vadd.f32 %v163_v23, %v2565_v22 }
  0xd5   :  { %v180_v28 = vpack.c.bf16 %v178_v25, %v177_v24  ;;  %v176_v29 = vmax.f32 %v164_v26, 0.0 }
  0xd7   :  { %v179_v30 = vpack.c.bf16 %v176_v29, %v175_v27  ;;  %2202 = vmatprep.subr.bf16.mxu0 %v180_v28 }
  0xd8   :  { %2203 = vmatpush3.bf16.msra.mxu0 %v180_v28 }
  0xd9   :  { %2204 = vmatprep.subr.bf16.mxu0 %v179_v30 }
  0xdc   :  { %2205 = vmatpush3.bf16.msra.mxu0 %v179_v30 }
  0xdf   :  { %2207 = vmatmul.mubr.msk.bf16.vlgmr.msra.gmra.mxu0 %vm119_vm1, %v2547_v12 }
  0xe0   :  { %2222 = vmatprep.mubr.msk.bf16.mxu0 %vm119_vm1, %v2535_v10 }
 0x19f   :  { %v2208_v31 = vpop.f32.mrf.mxu0 }
 0x1a0   :  { %v224_v33 = vadd.f32 %v2208_v31, %v2556_v13 }
 0x1a1   :  { %v215_v32 = vpop.f32.mrf.mxu0 }
 0x1a2   :  { %v216_v35 = vadd.f32 %v215_v32, %v2558_v15  ;;  %v232_v38 = vmax.f32 %v224_v33, 0.0 }
 0x1a3   :  { %v2209_v34 = vpop.f32.mrf.mxu0 }
 0x1a4   :  { %v227_v36 = vadd.f32 %v2209_v34, %v2561_v18  ;;  %v230_v41 = vmax.f32 %v216_v35, 0.0 }
 0x1a5   :  { %v218_v37 = vpop.f32.mrf.mxu0 }
 0x1a6   :  { %v233_v39 = vmax.f32 %v227_v36, 0.0  ;;  %v219_v40 = vadd.f32 %v218_v37, %v2565_v22 }
 0x1a8   :  { %v235_v42 = vpack.c.bf16 %v233_v39, %v232_v38  ;;  %v231_v43 = vmax.f32 %v219_v40, 0.0 }
 0x1aa   :  { %v234_v44 = vpack.c.bf16 %v231_v43, %v230_v41  ;;  %2210 = vmatprep.subr.bf16.mxu1 %v235_v42 }
 0x1ab   :  { %2211 = vmatpush3.bf16.msra.mxu1 %v235_v42 }
 0x1ac   :  { %2212 = vmatprep.subr.bf16.mxu1 %v234_v44 }
 0x1af   :  { %2213 = vmatpush3.bf16.msra.mxu1 %v234_v44 }
 0x1b2   :  { %2215 = vmatmul.mubr.msk.bf16.vlgmr.msra.gmra.mxu1 %vm119_vm1, %v2547_v12 }
 0x1b3   :  { %2230 = vmatprep.mubr.msk.bf16.mxu1 %vm119_vm1, %v2535_v10 }
 0x272   :  { %v2216_v45 = vpop.f32.mrf.mxu1 }
 0x273   :  { %v279_v47 = vadd.f32 %v2216_v45, %v2556_v13 }
 0x274   :  { %v270_v46 = vpop.f32.mrf.mxu1 }
 0x275   :  { %v271_v49 = vadd.f32 %v270_v46, %v2558_v15  ;;  %v287_v52 = vmax.f32 %v279_v47, 0.0 }
 0x276   :  { %v2217_v48 = vpop.f32.mrf.mxu1 }
 0x277   :  { %v282_v50 = vadd.f32 %v2217_v48, %v2561_v18  ;;  %v285_v55 = vmax.f32 %v271_v49, 0.0 }
 0x278   :  { %v273_v51 = vpop.f32.mrf.mxu1 }
 0x279   :  { %v288_v53 = vmax.f32 %v282_v50, 0.0  ;;  %v274_v54 = vadd.f32 %v273_v51, %v2565_v22 }
 0x27b   :  { %v290_v56 = vpack.c.bf16 %v288_v53, %v287_v52  ;;  %v286_v57 = vmax.f32 %v274_v54, 0.0 }
 0x27d   :  { %v289_v58 = vpack.c.bf16 %v286_v57, %v285_v55  ;;  %2218 = vmatprep.subr.bf16.mxu0 %v290_v56 }
 0x27e   :  { %2219 = vmatpush3.bf16.msra.mxu0 %v290_v56 }
 0x27f   :  { %2220 = vmatprep.subr.bf16.mxu0 %v289_v58 }
 0x282   :  { %2221 = vmatpush3.bf16.msra.mxu0 %v289_v58 }
 0x285   :  { %2223 = vmatmul.mubr.msk.bf16.vlgmr.msra.gmra.mxu0 %vm119_vm1, %v2547_v12 }
 0x286   :  { %2238 = vmatprep.mubr.msk.bf16.mxu0 %vm119_vm1, %v2535_v10 }
 0x345   :  { %v2224_v59 = vpop.f32.mrf.mxu0 }
 0x346   :  { %v334_v61 = vadd.f32 %v2224_v59, %v2556_v13 }
 0x347   :  { %v325_v60 = vpop.f32.mrf.mxu0 }
 0x348   :  { %v326_v63 = vadd.f32 %v325_v60, %v2558_v15  ;;  %v342_v2 = vmax.f32 %v334_v61, 0.0 }
 0x349   :  { %v2225_v62 = vpop.f32.mrf.mxu0 }
 0x34a   :  { %v337_v0 = vadd.f32 %v2225_v62, %v2561_v18  ;;  %v340_v5 = vmax.f32 %v326_v63, 0.0 }
 0x34b   :  { %v328_v1 = vpop.f32.mrf.mxu0 }
 0x34c   :  { %v343_v3 = vmax.f32 %v337_v0, 0.0  ;;  %v329_v4 = vadd.f32 %v328_v1, %v2565_v22 }
 0x34e   :  { %v345_v6 = vpack.c.bf16 %v343_v3, %v342_v2  ;;  %v341_v7 = vmax.f32 %v329_v4, 0.0 }
 0x350   :  { %v344_v8 = vpack.c.bf16 %v341_v7, %v340_v5  ;;  %2226 = vmatprep.subr.bf16.mxu1 %v345_v6 }
 0x351   :  { %2227 = vmatpush3.bf16.msra.mxu1 %v345_v6 }
 0x352   :  { %2228 = vmatprep.subr.bf16.mxu1 %v344_v8 }
 0x355   :  { %2229 = vmatpush3.bf16.msra.mxu1 %v344_v8 }
 0x358   :  { %2231 = vmatmul.mubr.msk.bf16.vlgmr.msra.gmra.mxu1 %vm119_vm1, %v2547_v12 }
 0x359   :  { %2246 = vmatprep.mubr.msk.bf16.mxu1 %vm119_vm1, %v2535_v10 }
 0x418   :  { %v2232_v11 = vpop.f32.mrf.mxu1 }
 0x419   :  { %v389_v16 = vadd.f32 %v2232_v11, %v2556_v13 }
 0x41a   :  { %v380_v14 = vpop.f32.mrf.mxu1 }
 0x41b   :  { %v381_v19 = vadd.f32 %v380_v14, %v2558_v15  ;;  %v397_v23 = vmax.f32 %v389_v16, 0.0 }
 0x41c   :  { %v2233_v17 = vpop.f32.mrf.mxu1 }
 0x41d   :  { %v392_v20 = vadd.f32 %v2233_v17, %v2561_v18  ;;  %v395_v26 = vmax.f32 %v381_v19, 0.0 }
 0x41e   :  { %v383_v21 = vpop.f32.mrf.mxu1 }
 0x41f   :  { %v398_v24 = vmax.f32 %v392_v20, 0.0  ;;  %v384_v25 = vadd.f32 %v383_v21, %v2565_v22 }
 0x421   :  { %v400_v27 = vpack.c.bf16 %v398_v24, %v397_v23  ;;  %v396_v28 = vmax.f32 %v384_v25, 0.0 }
 0x423   :  { %v399_v29 = vpack.c.bf16 %v396_v28, %v395_v26  ;;  %2234 = vmatprep.subr.bf16.mxu0 %v400_v27 }
 0x424   :  { %2235 = vmatpush3.bf16.msra.mxu0 %v400_v27 }
 0x425   :  { %2236 = vmatprep.subr.bf16.mxu0 %v399_v29 }
 0x428   :  { %2237 = vmatpush3.bf16.msra.mxu0 %v399_v29 }
 0x42b   :  { %2239 = vmatmul.mubr.msk.bf16.vlgmr.msra.gmra.mxu0 %vm119_vm1, %v2547_v12 }
 0x42c   :  { %2254 = vmatprep.mubr.msk.bf16.mxu0 %vm119_vm1, %v2535_v10 }
 0x4eb   :  { %v2240_v30 = vpop.f32.mrf.mxu0 }
 0x4ec   :  { %v444_v32 = vadd.f32 %v2240_v30, %v2556_v13 }
 0x4ed   :  { %v435_v31 = vpop.f32.mrf.mxu0 }
 0x4ee   :  { %v436_v34 = vadd.f32 %v435_v31, %v2558_v15  ;;  %v452_v37 = vmax.f32 %v444_v32, 0.0 }
 0x4ef   :  { %v2241_v33 = vpop.f32.mrf.mxu0 }
 0x4f0   :  { %v447_v35 = vadd.f32 %v2241_v33, %v2561_v18  ;;  %v450_v40 = vmax.f32 %v436_v34, 0.0 }
 0x4f1   :  { %v438_v36 = vpop.f32.mrf.mxu0 }
 0x4f2   :  { %v453_v38 = vmax.f32 %v447_v35, 0.0  ;;  %v439_v39 = vadd.f32 %v438_v36, %v2565_v22 }
 0x4f4   :  { %v455_v41 = vpack.c.bf16 %v453_v38, %v452_v37  ;;  %v451_v42 = vmax.f32 %v439_v39, 0.0 }
 0x4f6   :  { %v454_v43 = vpack.c.bf16 %v451_v42, %v450_v40  ;;  %2242 = vmatprep.subr.bf16.mxu1 %v455_v41 }
 0x4f7   :  { %2243 = vmatpush3.bf16.msra.mxu1 %v455_v41 }
 0x4f8   :  { %2244 = vmatprep.subr.bf16.mxu1 %v454_v43 }
 0x4fb   :  { %2245 = vmatpush3.bf16.msra.mxu1 %v454_v43 }
 0x4fe   :  { %2247 = vmatmul.mubr.msk.bf16.vlgmr.msra.gmra.mxu1 %vm119_vm1, %v2547_v12 }
 0x4ff   :  { %2262 = vmatprep.mubr.msk.bf16.mxu1 %vm119_vm1, %v2535_v10 }
 0x5be   :  { %v2248_v44 = vpop.f32.mrf.mxu1 }
 0x5bf   :  { %v499_v46 = vadd.f32 %v2248_v44, %v2556_v13 }
 0x5c0   :  { %v490_v45 = vpop.f32.mrf.mxu1 }
 0x5c1   :  { %v491_v48 = vadd.f32 %v490_v45, %v2558_v15  ;;  %v507_v51 = vmax.f32 %v499_v46, 0.0 }
 0x5c2   :  { %v2249_v47 = vpop.f32.mrf.mxu1 }
 0x5c3   :  { %v502_v49 = vadd.f32 %v2249_v47, %v2561_v18  ;;  %v505_v54 = vmax.f32 %v491_v48, 0.0 }
 0x5c4   :  { %v493_v50 = vpop.f32.mrf.mxu1 }
 0x5c5   :  { %v508_v52 = vmax.f32 %v502_v49, 0.0  ;;  %v494_v53 = vadd.f32 %v493_v50, %v2565_v22 }
 0x5c7   :  { %v510_v55 = vpack.c.bf16 %v508_v52, %v507_v51  ;;  %v506_v56 = vmax.f32 %v494_v53, 0.0 }
 0x5c9   :  { %v509_v57 = vpack.c.bf16 %v506_v56, %v505_v54  ;;  %2250 = vmatprep.subr.bf16.mxu0 %v510_v55 }
 0x5ca   :  { %2251 = vmatpush3.bf16.msra.mxu0 %v510_v55 }
 0x5cb   :  { %2252 = vmatprep.subr.bf16.mxu0 %v509_v57 }
 0x5ce   :  { %2253 = vmatpush3.bf16.msra.mxu0 %v509_v57 }
 0x5d1   :  { %2255 = vmatmul.mubr.msk.bf16.vlgmr.msra.gmra.mxu0 %vm119_vm1, %v2547_v12 }
 0x5d2   :  { %2270 = vmatprep.mubr.msk.bf16.mxu0 %vm119_vm1, %v2535_v10 }
 0x691   :  { %v2256_v58 = vpop.f32.mrf.mxu0 }
 0x692   :  { %v554_v60 = vadd.f32 %v2256_v58, %v2556_v13 }
 0x693   :  { %v545_v59 = vpop.f32.mrf.mxu0 }
 0x694   :  { %v546_v62 = vadd.f32 %v545_v59, %v2558_v15  ;;  %v562_v1 = vmax.f32 %v554_v60, 0.0 }
 0x695   :  { %v2257_v61 = vpop.f32.mrf.mxu0 }
 0x696   :  { %v557_v63 = vadd.f32 %v2257_v61, %v2561_v18  ;;  %v560_v4 = vmax.f32 %v546_v62, 0.0 }
 0x697   :  { %v548_v0 = vpop.f32.mrf.mxu0 }
 0x698   :  { %v563_v2 = vmax.f32 %v557_v63, 0.0  ;;  %v549_v3 = vadd.f32 %v548_v0, %v2565_v22 }
 0x69a   :  { %v565_v5 = vpack.c.bf16 %v563_v2, %v562_v1  ;;  %v561_v6 = vmax.f32 %v549_v3, 0.0 }
 0x69c   :  { %v564_v7 = vpack.c.bf16 %v561_v6, %v560_v4  ;;  %2258 = vmatprep.subr.bf16.mxu1 %v565_v5 }
 0x69d   :  { %2259 = vmatpush3.bf16.msra.mxu1 %v565_v5 }
 0x69e   :  { %2260 = vmatprep.subr.bf16.mxu1 %v564_v7 }
 0x6a1   :  { %2261 = vmatpush3.bf16.msra.mxu1 %v564_v7 }
 0x6a4   :  { %2263 = vmatmul.mubr.msk.bf16.vlgmr.msra.gmra.mxu1 %vm119_vm1, %v2547_v12 }
 0x6a5   :  { %2278 = vmatprep.mubr.msk.bf16.mxu1 %vm119_vm1, %v2535_v10 }
 0x764   :  { %v2264_v8 = vpop.f32.mrf.mxu1 }
 0x765   :  { %v609_v14 = vadd.f32 %v2264_v8, %v2556_v13 }
 0x766   :  { %v600_v11 = vpop.f32.mrf.mxu1 }
 0x767   :  { %v601_v17 = vadd.f32 %v600_v11, %v2558_v15  ;;  %v617_v21 = vmax.f32 %v609_v14, 0.0 }
 0x768   :  { %v2265_v16 = vpop.f32.mrf.mxu1 }
 0x769   :  { %v612_v19 = vadd.f32 %v2265_v16, %v2561_v18  ;;  %v615_v25 = vmax.f32 %v601_v17, 0.0 }
 0x76a   :  { %v603_v20 = vpop.f32.mrf.mxu1 }
 0x76b   :  { %v618_v23 = vmax.f32 %v612_v19, 0.0  ;;  %v604_v24 = vadd.f32 %v603_v20, %v2565_v22 }
 0x76d   :  { %v620_v26 = vpack.c.bf16 %v618_v23, %v617_v21  ;;  %v616_v27 = vmax.f32 %v604_v24, 0.0 }
 0x76f   :  { %v619_v28 = vpack.c.bf16 %v616_v27, %v615_v25  ;;  %2266 = vmatprep.subr.bf16.mxu0 %v620_v26 }
 0x770   :  { %2267 = vmatpush3.bf16.msra.mxu0 %v620_v26 }
 0x771   :  { %2268 = vmatprep.subr.bf16.mxu0 %v619_v28 }
 0x774   :  { %2269 = vmatpush3.bf16.msra.mxu0 %v619_v28 }
 0x777   :  { %2271 = vmatmul.mubr.msk.bf16.vlgmr.msra.gmra.mxu0 %vm119_vm1, %v2547_v12 }
 0x778   :  { %2286 = vmatprep.mubr.msk.bf16.mxu0 %vm119_vm1, %v2535_v10 }
 0x837   :  { %v2272_v29 = vpop.f32.mrf.mxu0 }
 0x838   :  { %v664_v31 = vadd.f32 %v2272_v29, %v2556_v13 }
 0x839   :  { %v655_v30 = vpop.f32.mrf.mxu0 }
 0x83a   :  { %v656_v33 = vadd.f32 %v655_v30, %v2558_v15  ;;  %v672_v36 = vmax.f32 %v664_v31, 0.0 }
 0x83b   :  { %v2273_v32 = vpop.f32.mrf.mxu0 }
 0x83c   :  { %v667_v34 = vadd.f32 %v2273_v32, %v2561_v18  ;;  %v670_v39 = vmax.f32 %v656_v33, 0.0 }
 0x83d   :  { %v658_v35 = vpop.f32.mrf.mxu0 }
 0x83e   :  { %v673_v37 = vmax.f32 %v667_v34, 0.0  ;;  %v659_v38 = vadd.f32 %v658_v35, %v2565_v22 }
 0x840   :  { %v675_v40 = vpack.c.bf16 %v673_v37, %v672_v36  ;;  %v671_v41 = vmax.f32 %v659_v38, 0.0 }
 0x842   :  { %v674_v42 = vpack.c.bf16 %v671_v41, %v670_v39  ;;  %2274 = vmatprep.subr.bf16.mxu1 %v675_v40 }
 0x843   :  { %2275 = vmatpush3.bf16.msra.mxu1 %v675_v40 }
 0x844   :  { %2276 = vmatprep.subr.bf16.mxu1 %v674_v42 }
 0x847   :  { %2277 = vmatpush3.bf16.msra.mxu1 %v674_v42 }
 0x84a   :  { %2279 = vmatmul.mubr.msk.bf16.vlgmr.msra.gmra.mxu1 %vm119_vm1, %v2547_v12 }
 0x84b   :  { %2294 = vmatprep.mubr.msk.bf16.mxu1 %vm119_vm1, %v2535_v10 }
 0x90a   :  { %v2280_v43 = vpop.f32.mrf.mxu1 }
 0x90b   :  { %v719_v45 = vadd.f32 %v2280_v43, %v2556_v13 }
 0x90c   :  { %v710_v44 = vpop.f32.mrf.mxu1 }
 0x90d   :  { %v711_v47 = vadd.f32 %v710_v44, %v2558_v15  ;;  %v727_v50 = vmax.f32 %v719_v45, 0.0 }
 0x90e   :  { %v2281_v46 = vpop.f32.mrf.mxu1 }
 0x90f   :  { %v722_v48 = vadd.f32 %v2281_v46, %v2561_v18  ;;  %v725_v53 = vmax.f32 %v711_v47, 0.0 }
 0x910   :  { %v713_v49 = vpop.f32.mrf.mxu1 }
 0x911   :  { %v728_v51 = vmax.f32 %v722_v48, 0.0  ;;  %v714_v52 = vadd.f32 %v713_v49, %v2565_v22 }
 0x913   :  { %v730_v54 = vpack.c.bf16 %v728_v51, %v727_v50  ;;  %v726_v55 = vmax.f32 %v714_v52, 0.0 }
 0x915   :  { %v729_v56 = vpack.c.bf16 %v726_v55, %v725_v53  ;;  %2282 = vmatprep.subr.bf16.mxu0 %v730_v54 }
 0x916   :  { %2283 = vmatpush3.bf16.msra.mxu0 %v730_v54 }
 0x917   :  { %2284 = vmatprep.subr.bf16.mxu0 %v729_v56 }
 0x91a   :  { %2285 = vmatpush3.bf16.msra.mxu0 %v729_v56 }
 0x91d   :  { %2287 = vmatmul.mubr.msk.bf16.vlgmr.msra.gmra.mxu0 %vm119_vm1, %v2547_v12 }
 0x91e   :  { %2302 = vmatprep.mubr.msk.bf16.mxu0 %vm119_vm1, %v2535_v10 }
 0x9dd   :  { %v2288_v57 = vpop.f32.mrf.mxu0 }
 0x9de   :  { %v774_v59 = vadd.f32 %v2288_v57, %v2556_v13 }
 0x9df   :  { %v765_v58 = vpop.f32.mrf.mxu0 }
 0x9e0   :  { %v766_v61 = vadd.f32 %v765_v58, %v2558_v15  ;;  %v782_v0 = vmax.f32 %v774_v59, 0.0 }
 0x9e1   :  { %v2289_v60 = vpop.f32.mrf.mxu0 }
 0x9e2   :  { %v777_v62 = vadd.f32 %v2289_v60, %v2561_v18  ;;  %v780_v3 = vmax.f32 %v766_v61, 0.0 }
 0x9e3   :  { %v768_v63 = vpop.f32.mrf.mxu0 }
 0x9e4   :  { %v783_v1 = vmax.f32 %v777_v62, 0.0  ;;  %v769_v2 = vadd.f32 %v768_v63, %v2565_v22 }
 0x9e6   :  { %v785_v4 = vpack.c.bf16 %v783_v1, %v782_v0  ;;  %v781_v5 = vmax.f32 %v769_v2, 0.0 }
 0x9e8   :  { %v784_v6 = vpack.c.bf16 %v781_v5, %v780_v3  ;;  %2290 = vmatprep.subr.bf16.mxu1 %v785_v4 }
 0x9e9   :  { %2291 = vmatpush3.bf16.msra.mxu1 %v785_v4 }
 0x9ea   :  { %2292 = vmatprep.subr.bf16.mxu1 %v784_v6 }
 0x9ed   :  { %2293 = vmatpush3.bf16.msra.mxu1 %v784_v6 }
 0x9f0   :  { %2295 = vmatmul.mubr.msk.bf16.vlgmr.msra.gmra.mxu1 %vm119_vm1, %v2547_v12 }
 0x9f1   :  { %2310 = vmatprep.mubr.msk.bf16.mxu1 %vm119_vm1, %v2535_v10 }
 0xab0   :  { %v2296_v7 = vpop.f32.mrf.mxu1 }
 0xab1   :  { %v829_v11 = vadd.f32 %v2296_v7, %v2556_v13 }
 0xab2   :  { %v820_v8 = vpop.f32.mrf.mxu1 }
 0xab3   :  { %v821_v16 = vadd.f32 %v820_v8, %v2558_v15  ;;  %v837_v20 = vmax.f32 %v829_v11, 0.0 }
 0xab4   :  { %v2297_v14 = vpop.f32.mrf.mxu1 }
 0xab5   :  { %v832_v17 = vadd.f32 %v2297_v14, %v2561_v18  ;;  %v835_v24 = vmax.f32 %v821_v16, 0.0 }
 0xab6   :  { %v823_v19 = vpop.f32.mrf.mxu1 }
 0xab7   :  { %v838_v21 = vmax.f32 %v832_v17, 0.0  ;;  %v824_v23 = vadd.f32 %v823_v19, %v2565_v22 }
 0xab9   :  { %v840_v25 = vpack.c.bf16 %v838_v21, %v837_v20  ;;  %v836_v26 = vmax.f32 %v824_v23, 0.0 }
 0xabb   :  { %v839_v27 = vpack.c.bf16 %v836_v26, %v835_v24  ;;  %2298 = vmatprep.subr.bf16.mxu0 %v840_v25 }
 0xabc   :  { %2299 = vmatpush3.bf16.msra.mxu0 %v840_v25 }
 0xabd   :  { %2300 = vmatprep.subr.bf16.mxu0 %v839_v27 }
 0xac0   :  { %2301 = vmatpush3.bf16.msra.mxu0 %v839_v27 }
 0xac3   :  { %2303 = vmatmul.mubr.msk.bf16.vlgmr.msra.gmra.mxu0 %vm119_vm1, %v2547_v12 }
 0xac4   :  { %2318 = vmatprep.mubr.msk.bf16.mxu0 %vm119_vm1, %v2535_v10 }
 0xb83   :  { %v2304_v28 = vpop.f32.mrf.mxu0 }
 0xb84   :  { %v884_v30 = vadd.f32 %v2304_v28, %v2556_v13 }
 0xb85   :  { %v875_v29 = vpop.f32.mrf.mxu0 }
 0xb86   :  { %v876_v32 = vadd.f32 %v875_v29, %v2558_v15  ;;  %v892_v35 = vmax.f32 %v884_v30, 0.0 }
 0xb87   :  { %v2305_v31 = vpop.f32.mrf.mxu0 }
 0xb88   :  { %v887_v33 = vadd.f32 %v2305_v31, %v2561_v18  ;;  %v890_v38 = vmax.f32 %v876_v32, 0.0 }
 0xb89   :  { %v878_v34 = vpop.f32.mrf.mxu0 }
 0xb8a   :  { %v893_v36 = vmax.f32 %v887_v33, 0.0  ;;  %v879_v37 = vadd.f32 %v878_v34, %v2565_v22 }
 0xb8c   :  { %v895_v39 = vpack.c.bf16 %v893_v36, %v892_v35  ;;  %v891_v40 = vmax.f32 %v879_v37, 0.0 }
 0xb8e   :  { %v894_v41 = vpack.c.bf16 %v891_v40, %v890_v38  ;;  %2306 = vmatprep.subr.bf16.mxu1 %v895_v39 }
 0xb8f   :  { %2307 = vmatpush3.bf16.msra.mxu1 %v895_v39 }
 0xb90   :  { %2308 = vmatprep.subr.bf16.mxu1 %v894_v41 }
 0xb93   :  { %2309 = vmatpush3.bf16.msra.mxu1 %v894_v41 }
 0xb96   :  { %2311 = vmatmul.mubr.msk.bf16.vlgmr.msra.gmra.mxu1 %vm119_vm1, %v2547_v12 }
 0xb97   :  { %2326 = vmatprep.mubr.msk.bf16.mxu1 %vm119_vm1, %v2535_v10 }
 0xc56   :  { %v2312_v42 = vpop.f32.mrf.mxu1 }
 0xc57   :  { %v939_v44 = vadd.f32 %v2312_v42, %v2556_v13 }
 0xc58   :  { %v930_v43 = vpop.f32.mrf.mxu1 }
 0xc59   :  { %v931_v46 = vadd.f32 %v930_v43, %v2558_v15  ;;  %v947_v49 = vmax.f32 %v939_v44, 0.0 }
 0xc5a   :  { %v2313_v45 = vpop.f32.mrf.mxu1 }
 0xc5b   :  { %v942_v47 = vadd.f32 %v2313_v45, %v2561_v18  ;;  %v945_v52 = vmax.f32 %v931_v46, 0.0 }
 0xc5c   :  { %v933_v48 = vpop.f32.mrf.mxu1 }
 0xc5d   :  { %v948_v50 = vmax.f32 %v942_v47, 0.0  ;;  %v934_v51 = vadd.f32 %v933_v48, %v2565_v22 }
 0xc5f   :  { %v950_v53 = vpack.c.bf16 %v948_v50, %v947_v49  ;;  %v946_v54 = vmax.f32 %v934_v51, 0.0 }
 0xc61   :  { %v949_v55 = vpack.c.bf16 %v946_v54, %v945_v52  ;;  %2314 = vmatprep.subr.bf16.mxu0 %v950_v53 }
 0xc62   :  { %2315 = vmatpush3.bf16.msra.mxu0 %v950_v53 }
 0xc63   :  { %2316 = vmatprep.subr.bf16.mxu0 %v949_v55 }
 0xc66   :  { %2317 = vmatpush3.bf16.msra.mxu0 %v949_v55 }
 0xc69   :  { %2319 = vmatmul.mubr.msk.bf16.vlgmr.msra.gmra.mxu0 %vm119_vm1, %v2547_v12 }
 0xc6a   :  { %2334 = vmatprep.mubr.msk.bf16.mxu0 %vm119_vm1, %v2535_v10 }
 0xd29   :  { %v2320_v56 = vpop.f32.mrf.mxu0 }
 0xd2a   :  { %v994_v58 = vadd.f32 %v2320_v56, %v2556_v13 }
 0xd2b   :  { %v985_v57 = vpop.f32.mrf.mxu0 }
 0xd2c   :  { %v986_v60 = vadd.f32 %v985_v57, %v2558_v15  ;;  %v1002_v63 = vmax.f32 %v994_v58, 0.0 }
 0xd2d   :  { %v2321_v59 = vpop.f32.mrf.mxu0 }
 0xd2e   :  { %v997_v61 = vadd.f32 %v2321_v59, %v2561_v18  ;;  %v1000_v2 = vmax.f32 %v986_v60, 0.0 }
 0xd2f   :  { %v988_v62 = vpop.f32.mrf.mxu0 }
 0xd30   :  { %v1003_v0 = vmax.f32 %v997_v61, 0.0  ;;  %v989_v1 = vadd.f32 %v988_v62, %v2565_v22 }
 0xd32   :  { %v1005_v3 = vpack.c.bf16 %v1003_v0, %v1002_v63  ;;  %v1001_v4 = vmax.f32 %v989_v1, 0.0 }
 0xd34   :  { %v1004_v5 = vpack.c.bf16 %v1001_v4, %v1000_v2  ;;  %2322 = vmatprep.subr.bf16.mxu1 %v1005_v3 }
 0xd35   :  { %2323 = vmatpush3.bf16.msra.mxu1 %v1005_v3 }
 0xd36   :  { %2324 = vmatprep.subr.bf16.mxu1 %v1004_v5 }
 0xd39   :  { %2325 = vmatpush3.bf16.msra.mxu1 %v1004_v5 }
 0xd3c   :  { %2327 = vmatmul.mubr.msk.bf16.vlgmr.msra.gmra.mxu1 %vm119_vm1, %v2547_v12 }
 0xd3d   :  { %2342 = vmatprep.mubr.msk.bf16.mxu1 %vm119_vm1, %v2535_v10 }
 0xdfc   :  { %v2328_v6 = vpop.f32.mrf.mxu1 }
 0xdfd   :  { %v1049_v8 = vadd.f32 %v2328_v6, %v2556_v13 }
 0xdfe   :  { %v1040_v7 = vpop.f32.mrf.mxu1 }
 0xdff   :  { %v1041_v14 = vadd.f32 %v1040_v7, %v2558_v15  ;;  %v1057_v19 = vmax.f32 %v1049_v8, 0.0 }
 0xe00   :  { %v2329_v11 = vpop.f32.mrf.mxu1 }
 0xe01   :  { %v1052_v16 = vadd.f32 %v2329_v11, %v2561_v18  ;;  %v1055_v23 = vmax.f32 %v1041_v14, 0.0 }
 0xe02   :  { %v1043_v17 = vpop.f32.mrf.mxu1 }
 0xe03   :  { %v1058_v20 = vmax.f32 %v1052_v16, 0.0  ;;  %v1044_v21 = vadd.f32 %v1043_v17, %v2565_v22 }
 0xe05   :  { %v1060_v24 = vpack.c.bf16 %v1058_v20, %v1057_v19  ;;  %v1056_v25 = vmax.f32 %v1044_v21, 0.0 }
 0xe07   :  { %v1059_v26 = vpack.c.bf16 %v1056_v25, %v1055_v23  ;;  %2330 = vmatprep.subr.bf16.mxu0 %v1060_v24 }
 0xe08   :  { %2331 = vmatpush3.bf16.msra.mxu0 %v1060_v24 }
 0xe09   :  { %2332 = vmatprep.subr.bf16.mxu0 %v1059_v26 }
 0xe0c   :  { %2333 = vmatpush3.bf16.msra.mxu0 %v1059_v26 }
 0xe0f   :  { %2335 = vmatmul.mubr.msk.bf16.vlgmr.msra.gmra.mxu0 %vm119_vm1, %v2547_v12 }
 0xe10   :  { %2350 = vmatprep.mubr.msk.bf16.mxu0 %vm119_vm1, %v2535_v10 }
 0xecf   :  { %v2336_v27 = vpop.f32.mrf.mxu0 }
 0xed0   :  { %v1104_v29 = vadd.f32 %v2336_v27, %v2556_v13 }
 0xed1   :  { %v1095_v28 = vpop.f32.mrf.mxu0 }
 0xed2   :  { %v1096_v31 = vadd.f32 %v1095_v28, %v2558_v15  ;;  %v1112_v34 = vmax.f32 %v1104_v29, 0.0 }
 0xed3   :  { %v2337_v30 = vpop.f32.mrf.mxu0 }
 0xed4   :  { %v1107_v32 = vadd.f32 %v2337_v30, %v2561_v18  ;;  %v1110_v37 = vmax.f32 %v1096_v31, 0.0 }
 0xed5   :  { %v1098_v33 = vpop.f32.mrf.mxu0 }
 0xed6   :  { %v1113_v35 = vmax.f32 %v1107_v32, 0.0  ;;  %v1099_v36 = vadd.f32 %v1098_v33, %v2565_v22 }
 0xed8   :  { %v1115_v38 = vpack.c.bf16 %v1113_v35, %v1112_v34  ;;  %v1111_v39 = vmax.f32 %v1099_v36, 0.0 }
 0xeda   :  { %v1114_v40 = vpack.c.bf16 %v1111_v39, %v1110_v37  ;;  %2338 = vmatprep.subr.bf16.mxu1 %v1115_v38 }
 0xedb   :  { %2339 = vmatpush3.bf16.msra.mxu1 %v1115_v38 }
 0xedc   :  { %2340 = vmatprep.subr.bf16.mxu1 %v1114_v40 }
 0xedf   :  { %2341 = vmatpush3.bf16.msra.mxu1 %v1114_v40 }
 0xee2   :  { %2343 = vmatmul.mubr.msk.bf16.vlgmr.msra.gmra.mxu1 %vm119_vm1, %v2547_v12 }
 0xee3   :  { %2358 = vmatprep.mubr.msk.bf16.mxu1 %vm119_vm1, %v2535_v10 }
 0xfa2   :  { %v2344_v41 = vpop.f32.mrf.mxu1 }
 0xfa3   :  { %v1159_v43 = vadd.f32 %v2344_v41, %v2556_v13 }
 0xfa4   :  { %v1150_v42 = vpop.f32.mrf.mxu1 }
 0xfa5   :  { %v1151_v45 = vadd.f32 %v1150_v42, %v2558_v15  ;;  %v1167_v48 = vmax.f32 %v1159_v43, 0.0 }
 0xfa6   :  { %v2345_v44 = vpop.f32.mrf.mxu1 }
 0xfa7   :  { %v1162_v46 = vadd.f32 %v2345_v44, %v2561_v18  ;;  %v1165_v51 = vmax.f32 %v1151_v45, 0.0 }
 0xfa8   :  { %v1153_v47 = vpop.f32.mrf.mxu1 }
 0xfa9   :  { %v1168_v49 = vmax.f32 %v1162_v46, 0.0  ;;  %v1154_v50 = vadd.f32 %v1153_v47, %v2565_v22 }
 0xfab   :  { %v1170_v52 = vpack.c.bf16 %v1168_v49, %v1167_v48  ;;  %v1166_v53 = vmax.f32 %v1154_v50, 0.0 }
 0xfad   :  { %v1169_v54 = vpack.c.bf16 %v1166_v53, %v1165_v51  ;;  %2346 = vmatprep.subr.bf16.mxu0 %v1170_v52 }
 0xfae   :  { %2347 = vmatpush3.bf16.msra.mxu0 %v1170_v52 }
 0xfaf   :  { %2348 = vmatprep.subr.bf16.mxu0 %v1169_v54 }
 0xfb2   :  { %2349 = vmatpush3.bf16.msra.mxu0 %v1169_v54 }
 0xfb5   :  { %2351 = vmatmul.mubr.msk.bf16.vlgmr.msra.gmra.mxu0 %vm119_vm1, %v2547_v12 }
 0xfb6   :  { %2366 = vmatprep.mubr.msk.bf16.mxu0 %vm119_vm1, %v2535_v10 }
0x1075   :  { %v2352_v55 = vpop.f32.mrf.mxu0 }
0x1076   :  { %v1214_v57 = vadd.f32 %v2352_v55, %v2556_v13 }
0x1077   :  { %v1205_v56 = vpop.f32.mrf.mxu0 }
0x1078   :  { %v1206_v59 = vadd.f32 %v1205_v56, %v2558_v15  ;;  %v1222_v62 = vmax.f32 %v1214_v57, 0.0 }
0x1079   :  { %v2353_v58 = vpop.f32.mrf.mxu0 }
0x107a   :  { %v1217_v60 = vadd.f32 %v2353_v58, %v2561_v18  ;;  %v1220_v1 = vmax.f32 %v1206_v59, 0.0 }
0x107b   :  { %v1208_v61 = vpop.f32.mrf.mxu0 }
0x107c   :  { %v1223_v63 = vmax.f32 %v1217_v60, 0.0  ;;  %v1209_v0 = vadd.f32 %v1208_v61, %v2565_v22 }
0x107e   :  { %v1225_v2 = vpack.c.bf16 %v1223_v63, %v1222_v62  ;;  %v1221_v3 = vmax.f32 %v1209_v0, 0.0 }
0x1080   :  { %v1224_v4 = vpack.c.bf16 %v1221_v3, %v1220_v1  ;;  %2354 = vmatprep.subr.bf16.mxu1 %v1225_v2 }
0x1081   :  { %2355 = vmatpush3.bf16.msra.mxu1 %v1225_v2 }
0x1082   :  { %2356 = vmatprep.subr.bf16.mxu1 %v1224_v4 }
0x1085   :  { %2357 = vmatpush3.bf16.msra.mxu1 %v1224_v4 }
0x1088   :  { %2359 = vmatmul.mubr.msk.bf16.vlgmr.msra.gmra.mxu1 %vm119_vm1, %v2547_v12 }
0x1089   :  { %2374 = vmatprep.mubr.msk.bf16.mxu1 %vm119_vm1, %v2535_v10 }
0x1148   :  { %v2360_v5 = vpop.f32.mrf.mxu1 }
0x1149   :  { %v1269_v7 = vadd.f32 %v2360_v5, %v2556_v13 }
0x114a   :  { %v1260_v6 = vpop.f32.mrf.mxu1 }
0x114b   :  { %v1261_v11 = vadd.f32 %v1260_v6, %v2558_v15  ;;  %v1277_v17 = vmax.f32 %v1269_v7, 0.0 }
0x114c   :  { %v2361_v8 = vpop.f32.mrf.mxu1 }
0x114d   :  { %v1272_v14 = vadd.f32 %v2361_v8, %v2561_v18  ;;  %v1275_v21 = vmax.f32 %v1261_v11, 0.0 }
0x114e   :  { %v1263_v16 = vpop.f32.mrf.mxu1 }
0x114f   :  { %v1278_v19 = vmax.f32 %v1272_v14, 0.0  ;;  %v1264_v20 = vadd.f32 %v1263_v16, %v2565_v22 }
0x1151   :  { %v1280_v23 = vpack.c.bf16 %v1278_v19, %v1277_v17  ;;  %v1276_v24 = vmax.f32 %v1264_v20, 0.0 }
0x1153   :  { %v1279_v25 = vpack.c.bf16 %v1276_v24, %v1275_v21  ;;  %2362 = vmatprep.subr.bf16.mxu0 %v1280_v23 }
0x1154   :  { %2363 = vmatpush3.bf16.msra.mxu0 %v1280_v23 }
0x1155   :  { %2364 = vmatprep.subr.bf16.mxu0 %v1279_v25 }
0x1158   :  { %2365 = vmatpush3.bf16.msra.mxu0 %v1279_v25 }
0x115b   :  { %2367 = vmatmul.mubr.msk.bf16.vlgmr.msra.gmra.mxu0 %vm119_vm1, %v2547_v12 }
0x115c   :  { %2382 = vmatprep.mubr.msk.bf16.mxu0 %vm119_vm1, %v2535_v10 }
0x121b   :  { %v2368_v26 = vpop.f32.mrf.mxu0 }
0x121c   :  { %v1324_v28 = vadd.f32 %v2368_v26, %v2556_v13 }
0x121d   :  { %v1315_v27 = vpop.f32.mrf.mxu0 }
0x121e   :  { %v1316_v30 = vadd.f32 %v1315_v27, %v2558_v15  ;;  %v1332_v33 = vmax.f32 %v1324_v28, 0.0 }
0x121f   :  { %v2369_v29 = vpop.f32.mrf.mxu0 }
0x1220   :  { %v1327_v31 = vadd.f32 %v2369_v29, %v2561_v18  ;;  %v1330_v36 = vmax.f32 %v1316_v30, 0.0 }
0x1221   :  { %v1318_v32 = vpop.f32.mrf.mxu0 }
0x1222   :  { %v1333_v34 = vmax.f32 %v1327_v31, 0.0  ;;  %v1319_v35 = vadd.f32 %v1318_v32, %v2565_v22 }
0x1224   :  { %v1335_v37 = vpack.c.bf16 %v1333_v34, %v1332_v33  ;;  %v1331_v38 = vmax.f32 %v1319_v35, 0.0 }
0x1226   :  { %v1334_v39 = vpack.c.bf16 %v1331_v38, %v1330_v36  ;;  %2370 = vmatprep.subr.bf16.mxu1 %v1335_v37  ;;  %v2776_v38 = vld [vmem:[%s2837_s0 + $0x8] sm:$0xff]  }
0x1227   :  { %2371 = vmatpush3.bf16.msra.mxu1 %v1335_v37 }
0x1228   :  { %2372 = vmatprep.subr.bf16.mxu1 %v1334_v39 }
0x122b   :  { %2373 = vmatpush3.bf16.msra.mxu1 %v1334_v39 }
0x122e   :  { %2375 = vmatmul.mubr.msk.bf16.vlgmr.msra.gmra.mxu1 %vm119_vm1, %v2547_v12 }
0x122f   :  { %2390 = vmatprep.mubr.msk.bf16.mxu1 %vm119_vm1, %v2535_v10 }
0x12ee   :  { %v2376_v40 = vpop.f32.mrf.mxu1 }
0x12ef   :  { %v1379_v42 = vadd.f32 %v2376_v40, %v2556_v13 }
0x12f0   :  { %v1370_v41 = vpop.f32.mrf.mxu1 }
0x12f1   :  { %v1371_v44 = vadd.f32 %v1370_v41, %v2558_v15  ;;  %v1387_v47 = vmax.f32 %v1379_v42, 0.0 }
0x12f2   :  { %v2377_v43 = vpop.f32.mrf.mxu1 }
0x12f3   :  { %v1382_v45 = vadd.f32 %v2377_v43, %v2561_v18  ;;  %v1385_v50 = vmax.f32 %v1371_v44, 0.0 }
0x12f4   :  { %v1373_v46 = vpop.f32.mrf.mxu1 }
0x12f5   :  { %v1388_v48 = vmax.f32 %v1382_v45, 0.0  ;;  %v1374_v49 = vadd.f32 %v1373_v46, %v2565_v22 }
0x12f7   :  { %v1390_v51 = vpack.c.bf16 %v1388_v48, %v1387_v47  ;;  %v1386_v52 = vmax.f32 %v1374_v49, 0.0 }
0x12f9   :  { %v1389_v53 = vpack.c.bf16 %v1386_v52, %v1385_v50  ;;  %2378 = vmatprep.subr.bf16.mxu0 %v1390_v51 }
0x12fa   :  { %2379 = vmatpush3.bf16.msra.mxu0 %v1390_v51 }
0x12fb   :  { %2380 = vmatprep.subr.bf16.mxu0 %v1389_v53 }
0x12fe   :  { %2381 = vmatpush3.bf16.msra.mxu0 %v1389_v53 }
0x1301   :  { %2383 = vmatmul.mubr.msk.bf16.vlgmr.msra.gmra.mxu0 %vm119_vm1, %v2547_v12 }
0x1302   :  { %2398 = vmatprep.mubr.msk.bf16.mxu0 %vm119_vm1, %v2535_v10 }
0x13c1   :  { %v2384_v54 = vpop.f32.mrf.mxu0 }
0x13c2   :  { %v1434_v56 = vadd.f32 %v2384_v54, %v2556_v13 }
0x13c3   :  { %v1425_v55 = vpop.f32.mrf.mxu0 }
0x13c4   :  { %v1426_v58 = vadd.f32 %v1425_v55, %v2558_v15  ;;  %v1442_v61 = vmax.f32 %v1434_v56, 0.0 }
0x13c5   :  { %v2385_v57 = vpop.f32.mrf.mxu0 }
0x13c6   :  { %v1437_v59 = vadd.f32 %v2385_v57, %v2561_v18  ;;  %v1440_v0 = vmax.f32 %v1426_v58, 0.0 }
0x13c7   :  { %v1428_v60 = vpop.f32.mrf.mxu0 }
0x13c8   :  { %v1443_v62 = vmax.f32 %v1437_v59, 0.0  ;;  %v1429_v63 = vadd.f32 %v1428_v60, %v2565_v22 }
0x13ca   :  { %v1445_v1 = vpack.c.bf16 %v1443_v62, %v1442_v61  ;;  %v1441_v2 = vmax.f32 %v1429_v63, 0.0 }
0x13cc   :  { %v1444_v3 = vpack.c.bf16 %v1441_v2, %v1440_v0  ;;  %2386 = vmatprep.subr.bf16.mxu1 %v1445_v1 }
0x13cd   :  { %2387 = vmatpush3.bf16.msra.mxu1 %v1445_v1 }
0x13ce   :  { %2388 = vmatprep.subr.bf16.mxu1 %v1444_v3 }
0x13d1   :  { %2389 = vmatpush3.bf16.msra.mxu1 %v1444_v3 }
0x13d4   :  { %2391 = vmatmul.mubr.msk.bf16.vlgmr.msra.gmra.mxu1 %vm119_vm1, %v2547_v12 }
0x13d5   :  { %2406 = vmatprep.mubr.msk.bf16.mxu1 %vm119_vm1, %v2535_v10  ;;  %v2765_v10 = vld [vmem:[%s2837_s0] sm:$0xff]  }
0x1494   :  { %v2392_v4 = vpop.f32.mrf.mxu1 }
0x1495   :  { %v1489_v6 = vadd.f32 %v2392_v4, %v2556_v13 }
0x1496   :  { %v1480_v5 = vpop.f32.mrf.mxu1 }
0x1497   :  { %v1481_v8 = vadd.f32 %v1480_v5, %v2558_v15  ;;  %v1497_v16 = vmax.f32 %v1489_v6, 0.0 }
0x1498   :  { %v2393_v7 = vpop.f32.mrf.mxu1 }
0x1499   :  { %v1492_v11 = vadd.f32 %v2393_v7, %v2561_v18  ;;  %v1495_v20 = vmax.f32 %v1481_v8, 0.0 }
0x149a   :  { %v1483_v14 = vpop.f32.mrf.mxu1 }
0x149b   :  { %v1498_v17 = vmax.f32 %v1492_v11, 0.0  ;;  %v1484_v19 = vadd.f32 %v1483_v14, %v2565_v22 }
0x149d   :  { %v1500_v21 = vpack.c.bf16 %v1498_v17, %v1497_v16  ;;  %v1496_v23 = vmax.f32 %v1484_v19, 0.0 }
0x149f   :  { %v1499_v24 = vpack.c.bf16 %v1496_v23, %v1495_v20  ;;  %2394 = vmatprep.subr.bf16.mxu0 %v1500_v21 }
0x14a0   :  { %2395 = vmatpush3.bf16.msra.mxu0 %v1500_v21 }
0x14a1   :  { %2396 = vmatprep.subr.bf16.mxu0 %v1499_v24 }
0x14a4   :  { %2397 = vmatpush3.bf16.msra.mxu0 %v1499_v24 }
0x14a7   :  { %2399 = vmatmul.mubr.msk.bf16.vlgmr.msra.gmra.mxu0 %vm119_vm1, %v2547_v12 }
0x14a8   :  { %2414 = vmatprep.mubr.msk.bf16.mxu0 %vm119_vm1, %v2765_v10 }
0x1567   :  { %v2400_v25 = vpop.f32.mrf.mxu0 }
0x1568   :  { %v1544_v27 = vadd.f32 %v2400_v25, %v2556_v13 }
0x1569   :  { %v1535_v26 = vpop.f32.mrf.mxu0 }
0x156a   :  { %v1536_v29 = vadd.f32 %v1535_v26, %v2558_v15  ;;  %v1552_v32 = vmax.f32 %v1544_v27, 0.0 }
0x156b   :  { %v2401_v28 = vpop.f32.mrf.mxu0 }
0x156c   :  { %v1547_v30 = vadd.f32 %v2401_v28, %v2561_v18  ;;  %v1550_v34 = vmax.f32 %v1536_v29, 0.0 }
0x156d   :  { %v1538_v31 = vpop.f32.mrf.mxu0 }
0x156e   :  { %v1553_v12 = vmax.f32 %v1547_v30, 0.0  ;;  %v1539_v33 = vadd.f32 %v1538_v31, %v2565_v22 }
0x1570   :  { %v1555_v35 = vpack.c.bf16 %v1553_v12, %v1552_v32  ;;  %v1551_v36 = vmax.f32 %v1539_v33, 0.0 }
0x1572   :  { %v1554_v37 = vpack.c.bf16 %v1551_v36, %v1550_v34  ;;  %2402 = vmatprep.subr.bf16.mxu1 %v1555_v35 }
0x1573   :  { %2403 = vmatpush3.bf16.msra.mxu1 %v1555_v35 }
0x1574   :  { %2404 = vmatprep.subr.bf16.mxu1 %v1554_v37 }
0x1577   :  { %2405 = vmatpush3.bf16.msra.mxu1 %v1554_v37 }
0x157a   :  { %2407 = vmatmul.mubr.msk.bf16.vlgmr.msra.gmra.mxu1 %vm119_vm1, %v2776_v38 }
0x157b   :  { %2422 = vmatprep.mubr.msk.bf16.mxu1 %vm119_vm1, %v2765_v10 }
0x163a   :  { %v2408_v39 = vpop.f32.mrf.mxu1 }
0x163b   :  { %v1599_v41 = vadd.f32 %v2408_v39, %v2556_v13 }
0x163c   :  { %v1590_v40 = vpop.f32.mrf.mxu1 }
0x163d   :  { %v1591_v43 = vadd.f32 %v1590_v40, %v2558_v15  ;;  %v1607_v46 = vmax.f32 %v1599_v41, 0.0 }
0x163e   :  { %v2409_v42 = vpop.f32.mrf.mxu1 }
0x163f   :  { %v1602_v44 = vadd.f32 %v2409_v42, %v2561_v18  ;;  %v1605_v49 = vmax.f32 %v1591_v43, 0.0 }
0x1640   :  { %v1593_v45 = vpop.f32.mrf.mxu1 }
0x1641   :  { %v1608_v47 = vmax.f32 %v1602_v44, 0.0  ;;  %v1594_v48 = vadd.f32 %v1593_v45, %v2565_v22 }
0x1643   :  { %v1610_v50 = vpack.c.bf16 %v1608_v47, %v1607_v46  ;;  %v1606_v51 = vmax.f32 %v1594_v48, 0.0 }
0x1645   :  { %v1609_v52 = vpack.c.bf16 %v1606_v51, %v1605_v49  ;;  %2410 = vmatprep.subr.bf16.mxu0 %v1610_v50  ;;  %v2473_v51 = vmov 0.0  }
0x1646   :  { %2411 = vmatpush3.bf16.msra.mxu0 %v1610_v50 }
0x1647   :  { %2412 = vmatprep.subr.bf16.mxu0 %v1609_v52 }
0x164a   :  { %2413 = vmatpush3.bf16.msra.mxu0 %v1609_v52  ;;  %v1887_v52 = vld [vmem:[%s2838_s3] sm:$0xf] }
0x164d   :  { %2415 = vmatmul.mubr.msk.bf16.vlgmr.msra.gmra.mxu0 %vm119_vm1, %v2776_v38 }
0x164e   :  { %2430 = vmatprep.mubr.msk.bf16.mxu0 %vm119_vm1, %v2765_v10 }
0x170d   :  { %v2416_v53 = vpop.f32.mrf.mxu0 }
0x170e   :  { %v1654_v55 = vadd.f32 %v2416_v53, %v2556_v13 }
0x170f   :  { %v1645_v54 = vpop.f32.mrf.mxu0 }
0x1710   :  { %v1646_v57 = vadd.f32 %v1645_v54, %v2558_v15  ;;  %v1662_v60 = vmax.f32 %v1654_v55, 0.0 }
0x1711   :  { %v2417_v56 = vpop.f32.mrf.mxu0 }
0x1712   :  { %v1657_v58 = vadd.f32 %v2417_v56, %v2561_v18  ;;  %v1660_v63 = vmax.f32 %v1646_v57, 0.0 }
0x1713   :  { %v1648_v59 = vpop.f32.mrf.mxu0 }
0x1714   :  { %v1663_v61 = vmax.f32 %v1657_v58, 0.0  ;;  %v1649_v62 = vadd.f32 %v1648_v59, %v2565_v22 }
0x1716   :  { %v1665_v0 = vpack.c.bf16 %v1663_v61, %v1662_v60  ;;  %v1661_v1 = vmax.f32 %v1649_v62, 0.0 }
0x1718   :  { %v1664_v2 = vpack.c.bf16 %v1661_v1, %v1660_v63  ;;  %2418 = vmatprep.subr.bf16.mxu1 %v1665_v0 }
0x1719   :  { %2419 = vmatpush3.bf16.msra.mxu1 %v1665_v0 }
0x171a   :  { %2420 = vmatprep.subr.bf16.mxu1 %v1664_v2 }
0x171d   :  { %2421 = vmatpush3.bf16.msra.mxu1 %v1664_v2 }
0x1720   :  { %2423 = vmatmul.mubr.msk.bf16.vlgmr.msra.gmra.mxu1 %vm119_vm1, %v2776_v38 }
0x1721   :  { %2438 = vmatprep.mubr.msk.bf16.mxu1 %vm119_vm1, %v2765_v10 }
0x17e0   :  { %v2424_v3 = vpop.f32.mrf.mxu1 }
0x17e1   :  { %v1709_v5 = vadd.f32 %v2424_v3, %v2556_v13 }
0x17e2   :  { %v1700_v4 = vpop.f32.mrf.mxu1 }
0x17e3   :  { %v1701_v7 = vadd.f32 %v1700_v4, %v2558_v15  ;;  %v1717_v14 = vmax.f32 %v1709_v5, 0.0 }
0x17e4   :  { %v2425_v6 = vpop.f32.mrf.mxu1 }
0x17e5   :  { %v1712_v8 = vadd.f32 %v2425_v6, %v2561_v18  ;;  %v1715_v19 = vmax.f32 %v1701_v7, 0.0 }
0x17e6   :  { %v1703_v11 = vpop.f32.mrf.mxu1 }
0x17e7   :  { %v1718_v16 = vmax.f32 %v1712_v8, 0.0  ;;  %v1704_v17 = vadd.f32 %v1703_v11, %v2565_v22 }
0x17e9   :  { %v1720_v20 = vpack.c.bf16 %v1718_v16, %v1717_v14  ;;  %v1716_v21 = vmax.f32 %v1704_v17, 0.0 }
0x17eb   :  { %v1719_v23 = vpack.c.bf16 %v1716_v21, %v1715_v19  ;;  %2426 = vmatprep.subr.bf16.mxu0 %v1720_v20 }
0x17ec   :  { %2427 = vmatpush3.bf16.msra.mxu0 %v1720_v20 }
0x17ed   :  { %2428 = vmatprep.subr.bf16.mxu0 %v1719_v23 }
0x17f0   :  { %2429 = vmatpush3.bf16.msra.mxu0 %v1719_v23 }
0x17f3   :  { %2431 = vmatmul.mubr.msk.bf16.vlgmr.msra.gmra.mxu0 %vm119_vm1, %v2776_v38 }
0x17f4   :  { %2446 = vmatprep.mubr.msk.bf16.mxu0 %vm119_vm1, %v2765_v10 }
0x18b3   :  { %v2432_v24 = vpop.f32.mrf.mxu0 }
0x18b4   :  { %v1764_v26 = vadd.f32 %v2432_v24, %v2556_v13 }
0x18b5   :  { %v1755_v25 = vpop.f32.mrf.mxu0 }
0x18b6   :  { %v1756_v28 = vadd.f32 %v1755_v25, %v2558_v15  ;;  %v1772_v31 = vmax.f32 %v1764_v26, 0.0 }
0x18b7   :  { %v2433_v27 = vpop.f32.mrf.mxu0 }
0x18b8   :  { %v1767_v29 = vadd.f32 %v2433_v27, %v2561_v18  ;;  %v1770_v33 = vmax.f32 %v1756_v28, 0.0 }
0x18b9   :  { %v1758_v30 = vpop.f32.mrf.mxu0 }
0x18ba   :  { %v1773_v32 = vmax.f32 %v1767_v29, 0.0  ;;  %v1759_v12 = vadd.f32 %v1758_v30, %v2565_v22 }
0x18bc   :  { %v1775_v34 = vpack.c.bf16 %v1773_v32, %v1772_v31  ;;  %v1771_v35 = vmax.f32 %v1759_v12, 0.0 }
0x18be   :  { %v1774_v36 = vpack.c.bf16 %v1771_v35, %v1770_v33  ;;  %2434 = vmatprep.subr.bf16.mxu1 %v1775_v34 }
0x18bf   :  { %2435 = vmatpush3.bf16.msra.mxu1 %v1775_v34 }
0x18c0   :  { %2436 = vmatprep.subr.bf16.mxu1 %v1774_v36 }
0x18c3   :  { %2437 = vmatpush3.bf16.msra.mxu1 %v1774_v36 }
0x18c4   :  { %2450 = vmatprep.subr.bf16.mxu1 %v2473_v51 }
0x18c6   :  { %2439 = vmatmul.mubr.msk.bf16.vlgmr.msra.gmra.mxu1 %vm119_vm1, %v2776_v38 }
0x18c7   :  { %2451 = vmatpush3.bf16.xpose.msra.mxu1 %v2530_v9  ;;  %2452 = vmatprep.mubr.msk.bf16.mxu1 %vm2474_vm2, %v2473_v51 }
0x18ce   :  { %2453 = vmatmul.mubr.msk.bf16.vlgmr.msra.gmra.mxu1 %vm44_vm0, %v1887_v52 }
0x1986   :  { %v2440_v10 = vpop.f32.mrf.mxu1 }
0x1987   :  { %v1819_v39 = vadd.f32 %v2440_v10, %v2556_v13 }
0x1988   :  { %v1810_v37 = vpop.f32.mrf.mxu1 }
0x1989   :  { %v1811_v41 = vadd.f32 %v1810_v37, %v2558_v15  ;;  %v1827_v44 = vmax.f32 %v1819_v39, 0.0 }
0x198a   :  { %v2441_v40 = vpop.f32.mrf.mxu1 }
0x198b   :  { %v1822_v42 = vadd.f32 %v2441_v40, %v2561_v18  ;;  %v1825_v47 = vmax.f32 %v1811_v41, 0.0 }
0x198c   :  { %v1813_v43 = vpop.f32.mrf.mxu1 }
0x198d   :  { %v1828_v45 = vmax.f32 %v1822_v42, 0.0  ;;  %v1814_v46 = vadd.f32 %v1813_v43, %v2565_v22 }
0x198f   :  { %v1830_v48 = vpack.c.bf16 %v1828_v45, %v1827_v44  ;;  %v1826_v49 = vmax.f32 %v1814_v46, 0.0 }
0x1991   :  { %v1829_v50 = vpack.c.bf16 %v1826_v49, %v1825_v47  ;;  %2442 = vmatprep.subr.bf16.mxu0 %v1830_v48 }
0x1992   :  { %2443 = vmatpush3.bf16.msra.mxu0 %v1830_v48 }
0x1993   :  { %2444 = vmatprep.subr.bf16.mxu0 %v1829_v50 }
0x1996   :  { %2445 = vmatpush3.bf16.msra.mxu0 %v1829_v50 }
0x1997   :  { %2456 = vmatprep.subr.bf16.mxu0 %v2473_v51 }
0x1999   :  { %2447 = vmatmul.mubr.msk.bf16.vlgmr.msra.gmra.mxu0 %vm119_vm1, %v2776_v38 }
0x199a   :  { %2460 = vmatprep.mubr.msk.bf16.mxu0 %vm2474_vm2, %v2473_v51 }
0x1a59   :  { %v2448_v53 = vpop.f32.mrf.mxu0 }
0x1a5a   :  { %v1874_v55 = vadd.f32 %v2448_v53, %v2556_v13  ;;  %v1884_v13 = vld [vmem:[%s2839_s2] sm:$0xf] }
0x1a5b   :  { %v1865_v54 = vpop.f32.mrf.mxu0 }
0x1a5c   :  { %v1882_v58 = vmax.f32 %v1874_v55, 0.0  ;;  %v1866_v9 = vadd.f32 %v1865_v54, %v2558_v15 }
0x1a5d   :  { %v2449_v56 = vpop.f32.mrf.mxu0 }
0x1a5e   :  { %v1877_v38 = vadd.f32 %v2449_v56, %v2561_v18  ;;  %v1880_v63 = vmax.f32 %v1866_v9, 0.0  ;;  %v1925_v18 = vpop.f32.mrf.mxu1 }
0x1a5f   :  { %v1868_v57 = vpop.f32.mrf.mxu0 }
0x1a60   :  { %v1883_v59 = vmax.f32 %v1877_v38, 0.0  ;;  %v1869_v60 = vadd.f32 %v1868_v57, %v2565_v22  ;;  %v2454_v1 = vpop.f32.mrf.mxu1 }
0x1a62   :  { %v1886_v61 = vpack.c.bf16 %v1883_v59, %v1882_v58  ;;  %v1881_v62 = vmax.f32 %v1869_v60, 0.0  ;;  %v1928_v2 = vpop.f32.mrf.mxu1 }
0x1a64   :  { %2457 = vmatpush3.bf16.msra.mxu0 %v1886_v61  ;;  %v1885_v0 = vpack.c.bf16 %v1881_v62, %v1880_v63  ;;  %v2455_v15 = vpop.f32.mrf.mxu1 }
0x1a65   :  { %2458 = vmatprep.subr.bf16.mxu0 %v2473_v51 }
0x1a68   :  { %2459 = vmatpush3.bf16.msra.mxu0 %v1885_v0 }
0x1a6b   :  { %2461 = vmatmul.mubr.msk.bf16.vlgmr.msra.gmra.mxu0 %vm119_vm1, %v1884_v13 }
0x1b2b   :  { %v1968_v3 = vpop.f32.mrf.mxu0 }
0x1b2c   :  { %v1969_v22 = vadd.f32 %v1968_v3, %v1925_v18 }
0x1b2d   :  { %v2462_v4 = vpop.f32.mrf.mxu0 }
0x1b2e   :  { %1975 = vst.msk [vmem:[%s2840_s6] sm:$0xff] %vm1974_vm3, %v1969_v22 }
0x1b2f   :  { %v1971_v5 = vpop.f32.mrf.mxu0 }
0x1b31   :  { %v2463_v6 = vpop.f32.mrf.mxu0 }

</bundles_post_ra>
